<compile_context>
chip_gen: v7x
topology: tpu7x:2x2x1
jax: 0.10.0
libtpu: 0.0.40
codegen_flags: <defaults>
</compile_context>

<pallas_src>
import jax
import jax.numpy as jnp
from jax.experimental import pallas as pl
from jax.experimental.pallas import tpu as pltpu

EPS = 1e-5


# --------------------------- sizing helpers ----------------------------------

def _vmem_budget():
    """(scoped vmem limit, per-pass block budget) derived from the chip."""
    cap = 64 * 1024 * 1024                      # safe default (v7x physical)
    try:
        info = pltpu.get_tpu_info()
        cap = int(getattr(info, "vmem_capacity_bytes", cap)) or cap
    except Exception:
        pass
    return (cap * 3) // 4, cap // 2             # 48/32 MiB v7x, 96/64 MiB v5e/v6e


def _choose_tiles(N, HW, Cg, Cl, F_int, budget_bytes):
    """Pick (NB, TM): NB images per grid step, TM lanes per step."""
    # f32 double-buffered activation blocks + bf16 cache blocks + temporaries.
    per_lane = max(8 * (Cg + Cl + 2 * F_int + 2), 16 * Cl + 16)
    max_lanes = max(128, budget_bytes // per_lane)

    if HW % 128 == 0:
        tm = max(128, min(HW, (max_lanes // 128) * 128))
        while HW % tm:
            tm -= 128
    else:
        tm = HW                                 # full-extent block is allowed

    nb = 1
    if tm == HW and HW <= 512:                  # amortize per-step overhead
        for cand in range(1, N + 1):
            if N % cand == 0 and cand * tm <= max_lanes and cand * tm <= 4096:
                nb = cand
    return nb, tm


# --------------------------- kernels ------------------------------------------

def _stats_kernel(g_ref, x_ref, wg_ref, wx_ref,
                  sg_ref, ssg_ref, sx_ref, ssx_ref):
    # Per-batch-block accumulators, resident across the m axis.
    @pl.when(pl.program_id(1) == 0)
    def _():
        sg_ref[...] = jnp.zeros_like(sg_ref)
        ssg_ref[...] = jnp.zeros_like(ssg_ref)
        sx_ref[...] = jnp.zeros_like(sx_ref)
        ssx_ref[...] = jnp.zeros_like(ssx_ref)

    wg = wg_ref[...]                            # bf16 (cast in wrapper)
    wx = wx_ref[...]
    for b in range(g_ref.shape[0]):
        g1 = jnp.dot(wg, g_ref[b].astype(jnp.bfloat16),
                     preferred_element_type=jnp.float32)
        x1 = jnp.dot(wx, x_ref[b].astype(jnp.bfloat16),
                     preferred_element_type=jnp.float32)
        sg_ref[...] += jnp.sum(g1, axis=-1, keepdims=True)
        ssg_ref[...] += jnp.sum(g1 * g1, axis=-1, keepdims=True)
        sx_ref[...] += jnp.sum(x1, axis=-1, keepdims=True)
        ssx_ref[...] += jnp.sum(x1 * x1, axis=-1, keepdims=True)


def _stats_cache_kernel(g_ref, x_ref, wg_ref, wx_ref,
                        g1_ref, x1_ref, sg_ref, ssg_ref, sx_ref, ssx_ref):
    # Same as _stats_kernel but also streams g1/x1 to HBM as bf16 so pass 2
    # never re-reads g/x nor redoes the Wg/Wx matmuls.
    @pl.when(pl.program_id(1) == 0)
    def _():
        sg_ref[...] = jnp.zeros_like(sg_ref)
        ssg_ref[...] = jnp.zeros_like(ssg_ref)
        sx_ref[...] = jnp.zeros_like(sx_ref)
        ssx_ref[...] = jnp.zeros_like(ssx_ref)

    wg = wg_ref[...]
    wx = wx_ref[...]
    for b in range(g_ref.shape[0]):
        g1 = jnp.dot(wg, g_ref[b].astype(jnp.bfloat16),
                     preferred_element_type=jnp.float32)
        x1 = jnp.dot(wx, x_ref[b].astype(jnp.bfloat16),
                     preferred_element_type=jnp.float32)
        g1_ref[b] = g1.astype(jnp.bfloat16)
        x1_ref[b] = x1.astype(jnp.bfloat16)
        sg_ref[...] += jnp.sum(g1, axis=-1, keepdims=True)
        ssg_ref[...] += jnp.sum(g1 * g1, axis=-1, keepdims=True)
        sx_ref[...] += jnp.sum(x1, axis=-1, keepdims=True)
        ssx_ref[...] += jnp.sum(x1 * x1, axis=-1, keepdims=True)


def _gate_recompute_kernel(g_ref, x_ref, wgf_ref, wxf_ref, bs_ref, wp_ref,
                           p_ref, sp_ref, spp_ref):
    # s = relu(bn(Wg@g) + bn(Wx@x)) via BN-folded weights; p = Wp @ s.
    # Also accumulates per-batch-block sum(p)/sum(p*p) for the psi BatchNorm.
    @pl.when(pl.program_id(1) == 0)
    def _():
        sp_ref[...] = jnp.zeros_like(sp_ref)
        spp_ref[...] = jnp.zeros_like(spp_ref)

    wgf = wgf_ref[...]                          # bf16 folded weights
    wxf = wxf_ref[...]
    bs = bs_ref[...]                            # (F_int, 1) f32
    wp = wp_ref[...]                            # (1, F_int) f32
    for b in range(g_ref.shape[0]):
        s = jnp.dot(wgf, g_ref[b].astype(jnp.bfloat16),
                    preferred_element_type=jnp.float32)
        s = s + jnp.dot(wxf, x_ref[b].astype(jnp.bfloat16),
                        preferred_element_type=jnp.float32)
        s = jnp.maximum(s + bs, 0.0)
        p = jnp.dot(wp, s, preferred_element_type=jnp.float32)   # (1, TM)
        p_ref[b] = p
        sp_ref[...] += jnp.sum(p, axis=-1, keepdims=True)
        spp_ref[...] += jnp.sum(p * p, axis=-1, keepdims=True)


def _gate_cached_kernel(g1_ref, x1_ref, ag_ref, ax_ref, bs_ref, wp_ref,
                        p_ref, sp_ref, spp_ref):
    # Pure affine + relu + (1,F_int) matmul over cached bf16 g1/x1 tiles.
    @pl.when(pl.program_id(1) == 0)
    def _():
        sp_ref[...] = jnp.zeros_like(sp_ref)
        spp_ref[...] = jnp.zeros_like(spp_ref)

    ag = ag_ref[...]                            # (F_int, 1) BN scales
    ax = ax_ref[...]
    bs = bs_ref[...]
    wp = wp_ref[...]
    for b in range(g1_ref.shape[0]):
        s = ag * g1_ref[b].astype(jnp.float32) + ax * x1_ref[b].astype(jnp.float32) + bs
        s = jnp.maximum(s, 0.0)
        p = jnp.dot(wp, s, preferred_element_type=jnp.float32)   # (1, TM)
        p_ref[b] = p
        sp_ref[...] += jnp.sum(p, axis=-1, keepdims=True)
        spp_ref[...] += jnp.sum(p * p, axis=-1, keepdims=True)


def _apply_kernel(x_ref, p_ref, ab_ref, out_ref):
    a = ab_ref[0]                               # psi-BN scale/shift (SMEM)
    c = ab_ref[1]
    for b in range(x_ref.shape[0]):
        psi = jax.nn.sigmoid(a * p_ref[b] + c)                   # (1, TM)
        out_ref[b] = x_ref[b] * psi                               # bcast over C


# --------------------------- wrapper -------------------------------------------

def attention_block(g, x, params):
    (wg, _bg, gam_g, bet_g,
     wx, _bx, gam_x, bet_x,
     wp, _bp, gam_p, bet_p) = params
    # _bg/_bx/_bp: pre-BN conv biases are exact no-ops under training-mode BN
    # (they only shift the batch mean) -> intentionally unused.

    N, Cg, H, W = g.shape
    _, Cl, _, _ = x.shape
    F_int = wg.shape[0]
    HW = H * W
    M = N * HW

    g3 = g.reshape(N, Cg, HW)                   # free reshapes (NCHW preserved)
    x3 = x.reshape(N, Cl, HW)

    vmem_limit, tile_budget = _vmem_budget()
    NB, TM = _choose_tiles(N, HW, Cg, Cl, F_int, tile_budget)
    grid = (N // NB, HW // TM)
    NBLK = N // NB

    # bf16 cache of g1/x1 wins when its write+read traffic beats re-reading g/x.
    use_cache = (2 * F_int) < (Cg + Cl)

    g_spec = pl.BlockSpec((NB, Cg, TM), lambda n, m: (n, 0, m))
    x_spec = pl.BlockSpec((NB, Cl, TM), lambda n, m: (n, 0, m))
    p_spec = pl.BlockSpec((NB, 1, TM), lambda n, m: (n, 0, m))
    g1_spec = pl.BlockSpec((NB, F_int, TM), lambda n, m: (n, 0, m))

    def bcast(shape):
        return pl.BlockSpec(shape, lambda n, m, _s=shape: (0,) * len(_s))

    stat_spec = pl.BlockSpec((None, F_int, 1), lambda n, m: (n, 0, 0))
    pstat_spec = pl.BlockSpec((None, 1, 1), lambda n, m: (n, 0, 0))

    stat_shape = jax.ShapeDtypeStruct((NBLK, F_int, 1), jnp.float32)
    pstat_shape = jax.ShapeDtypeStruct((NBLK, 1, 1), jnp.float32)

    cp_acc = pltpu.CompilerParams(dimension_semantics=("parallel", "arbitrary"),
                                  vmem_limit_bytes=vmem_limit)
    cp_par = pltpu.CompilerParams(dimension_semantics=("parallel", "parallel"),
                                  vmem_limit_bytes=vmem_limit)

    wg_bf = wg.astype(jnp.bfloat16)             # MXU inputs in bf16, f32 accum
    wx_bf = wx.astype(jnp.bfloat16)

    # ---- pass 1: per-batch-block sum / sumsq of g1 = Wg@g, x1 = Wx@x ----------
    if use_cache:
        g1c, x1c, sg, ssg, sx, ssx = pl.pallas_call(
            _stats_cache_kernel,
            grid=grid,
            in_specs=[g_spec, x_spec, bcast((F_int, Cg)), bcast((F_int, Cl))],
            out_specs=[g1_spec, g1_spec, stat_spec, stat_spec, stat_spec, stat_spec],
            out_shape=[jax.ShapeDtypeStruct((N, F_int, HW), jnp.bfloat16),
                       jax.ShapeDtypeStruct((N, F_int, HW), jnp.bfloat16),
                       stat_shape, stat_shape, stat_shape, stat_shape],
            compiler_params=cp_acc,
        )(g3, x3, wg_bf, wx_bf)
    else:
        sg, ssg, sx, ssx = pl.pallas_call(
            _stats_kernel,
            grid=grid,
            in_specs=[g_spec, x_spec, bcast((F_int, Cg)), bcast((F_int, Cl))],
            out_specs=[stat_spec, stat_spec, stat_spec, stat_spec],
            out_shape=[stat_shape, stat_shape, stat_shape, stat_shape],
            compiler_params=cp_acc,
        )(g3, x3, wg_bf, wx_bf)

    # ---- fold BN affine (tiny vectors; exact algebra) -------------------------
    cnt = jnp.float32(M)
    sg = jnp.sum(sg, axis=0)
    ssg = jnp.sum(ssg, axis=0)
    sx = jnp.sum(sx, axis=0)
    ssx = jnp.sum(ssx, axis=0)

    def bn_affine(s, ss, gamma, beta):
        mu = s / cnt
        var = jnp.maximum(ss / cnt - mu * mu, 0.0)   # biased var, guarded
        a = gamma.reshape(-1, 1) * jax.lax.rsqrt(var + EPS)
        return a, beta.reshape(-1, 1) - a * mu

    a_g, b_g = bn_affine(sg, ssg, gam_g, bet_g)
    a_x, b_x = bn_affine(sx, ssx, gam_x, bet_x)
    b_s = b_g + b_x

    # ---- pass 2: s = relu(bn(g1)+bn(x1)), p = Wp@s, psi-BN partials -----------
    p_shape = jax.ShapeDtypeStruct((N, 1, HW), jnp.float32)
    if use_cache:
        p, sp, spp = pl.pallas_call(
            _gate_cached_kernel,
            grid=grid,
            in_specs=[g1_spec, g1_spec, bcast((F_int, 1)), bcast((F_int, 1)),
                      bcast((F_int, 1)), bcast((1, F_int))],
            out_specs=[p_spec, pstat_spec, pstat_spec],
            out_shape=[p_shape, pstat_shape, pstat_shape],
            compiler_params=cp_acc,
        )(g1c, x1c, a_g, a_x, b_s, wp)
    else:
        wg_f = (wg * a_g).astype(jnp.bfloat16)
        wx_f = (wx * a_x).astype(jnp.bfloat16)
        p, sp, spp = pl.pallas_call(
            _gate_recompute_kernel,
            grid=grid,
            in_specs=[g_spec, x_spec, bcast((F_int, Cg)), bcast((F_int, Cl)),
                      bcast((F_int, 1)), bcast((1, F_int))],
            out_specs=[p_spec, pstat_spec, pstat_spec],
            out_shape=[p_shape, pstat_shape, pstat_shape],
            compiler_params=cp_acc,
        )(g3, x3, wg_f, wx_f, b_s, wp)

    # ---- psi BatchNorm scalars (from in-kernel partials) ----------------------
    mu_p = jnp.sum(sp) / cnt
    var_p = jnp.maximum(jnp.sum(spp) / cnt - mu_p * mu_p, 0.0)
    a_p = gam_p.reshape(()) * jax.lax.rsqrt(var_p + EPS)
    b_p = bet_p.reshape(()) - a_p * mu_p
    ab = jnp.stack([a_p, b_p]).astype(jnp.float32)     # (2,) SMEM scalars

    # ---- pass 3: out = x * sigmoid(a_p * p + b_p) -----------------------------
    # No input_output_alias: without caller-side donation it forces XLA to make
    # a defensive full copy of x, costing more HBM traffic than it saves.
    out3 = pl.pallas_call(
        _apply_kernel,
        grid=grid,
        in_specs=[x_spec, p_spec,
                  pl.BlockSpec(memory_space=pltpu.MemorySpace.SMEM)],
        out_specs=pl.BlockSpec((NB, Cl, TM), lambda n, m: (n, 0, m)),
        out_shape=jax.ShapeDtypeStruct((N, Cl, HW), jnp.float32),
        compiler_params=cp_par,
    )(x3, p, ab)

    return out3.reshape(N, Cl, H, W)


# --------------------------- params / reference --------------------------------

def make_params(key, F_g, F_l, F_int):
    ks = jax.random.split(key, 12)
    wg = jax.random.normal(ks[0], (F_int, F_g), jnp.float32) * 0.1
    bg = jax.random.normal(ks[1], (F_int,), jnp.float32) * 0.1
    wx = jax.random.normal(ks[2], (F_int, F_l), jnp.float32) * 0.1
    bx = jax.random.normal(ks[3], (F_int,), jnp.float32) * 0.1
    wp = jax.random.normal(ks[4], (1, F_int), jnp.float32) * 0.1
    bp = jax.random.normal(ks[5], (1,), jnp.float32) * 0.1
    gam_g = 1.0 + 0.1 * jax.random.normal(ks[6], (F_int,), jnp.float32)
    bet_g = 0.1 * jax.random.normal(ks[7], (F_int,), jnp.float32)
    gam_x = 1.0 + 0.1 * jax.random.normal(ks[8], (F_int,), jnp.float32)
    bet_x = 0.1 * jax.random.normal(ks[9], (F_int,), jnp.float32)
    gam_p = 1.0 + 0.1 * jax.random.normal(ks[10], (1,), jnp.float32)
    bet_p = 0.1 * jax.random.normal(ks[11], (1,), jnp.float32)
    return (wg, bg, gam_g, bet_g, wx, bx, gam_x, bet_x, wp, bp, gam_p, bet_p)


def attention_block_ref(g, x, params):
    # Pure-JAX reference with PyTorch semantics (conv bias + training-mode BN).
    (wg, bg, gam_g, bet_g, wx, bx, gam_x, bet_x, wp, bp, gam_p, bet_p) = params
    hi = jax.lax.Precision.HIGHEST

    def conv1x1(y, w, b):
        return jnp.einsum("oi,nihw->nohw", w, y, precision=hi) + b[None, :, None, None]

    def bn(y, gamma, beta):
        mu = jnp.mean(y, axis=(0, 2, 3), keepdims=True)
        var = jnp.mean((y - mu) ** 2, axis=(0, 2, 3), keepdims=True)
        yhat = (y - mu) * jax.lax.rsqrt(var + EPS)
        return yhat * gamma[None, :, None, None] + beta[None, :, None, None]

    g1 = bn(conv1x1(g, wg, bg), gam_g, bet_g)
    x1 = bn(conv1x1(x, wx, bx), gam_x, bet_x)
    s = jnp.maximum(g1 + x1, 0.0)
    psi = jax.nn.sigmoid(bn(conv1x1(s, wp, bp), gam_p, bet_p))
    return x * psi


if __name__ == "__main__":
    attn = jax.jit(attention_block)

    def run_case(name, N, C_g, C_l, F_int, H, W, key):
        kg, kx, kp = jax.random.split(key, 3)
        g = jax.random.normal(kg, (N, C_g, H, W), jnp.float32)
        x = jax.random.normal(kx, (N, C_l, H, W), jnp.float32)
        params = make_params(kp, C_g, C_l, F_int)
        out = attn(g, x, params)
        jax.block_until_ready(out)
        assert out.shape == (N, C_l, H, W)
        ref = attention_block_ref(g, x, params)
        err = float(jnp.max(jnp.abs(out - ref)))
        # Tolerance accounts for bf16 MXU inputs / bf16 g1-x1 cache (f32 accum).
        assert err < 3e-2, f"{name}: max abs err {err}"

    key = jax.random.PRNGKey(0)
    k1, k2 = jax.random.split(key)
    # Recompute path (2*F_int >= Cg+Cl), NB=2 multi-image blocking (small HW).
    run_case("recompute", N=2, C_g=4, C_l=4, F_int=8, H=16, W=16, key=k1)
    # bf16-cache path (2*F_int < Cg+Cl), NB=1, larger lane tile.
    run_case("cached", N=2, C_g=8, C_l=8, F_int=4, H=32, W=32, key=k2)
    print("KERNEL_OK")
</pallas_src>

<mosaic_0001>
module attributes {stable_mosaic.version = 11 : i64} {
  func.func @_stats_kernel(%arg0: i32, %arg1: i32, %arg2: memref<2x4x256xf32, #tpu.memory_space<vmem>>, %arg3: memref<2x4x256xf32, #tpu.memory_space<vmem>>, %arg4: memref<8x4xbf16, #tpu.memory_space<vmem>>, %arg5: memref<8x4xbf16, #tpu.memory_space<vmem>>, %arg6: memref<1x8x1xf32, #tpu.memory_space<vmem>>, %arg7: memref<1x8x1xf32, #tpu.memory_space<vmem>>, %arg8: memref<1x8x1xf32, #tpu.memory_space<vmem>>, %arg9: memref<1x8x1xf32, #tpu.memory_space<vmem>>) attributes {dimension_semantics = [#tpu.dimension_semantics<parallel>, #tpu.dimension_semantics<arbitrary>], iteration_bounds = array<i64: 1, 1>, scalar_prefetch = 0 : i64, scratch_operands = 0 : i64, tpu.core_type = #tpu.core_type<tc>, window_params = [{transform_indices = @transform_0, window_bounds = array<i64: 2, 4, 256>}, {transform_indices = @transform_1, window_bounds = array<i64: 2, 4, 256>}, {pipeline_mode = #tpu.pipeline_mode<synchronous>, transform_indices = @transform_2, window_bounds = array<i64: 8, 4>}, {pipeline_mode = #tpu.pipeline_mode<synchronous>, transform_indices = @transform_3, window_bounds = array<i64: 8, 4>}, {transform_indices = @transform_4, window_bounds = array<i64: 1, 8, 1>}, {transform_indices = @transform_5, window_bounds = array<i64: 1, 8, 1>}, {transform_indices = @transform_6, window_bounds = array<i64: 1, 8, 1>}, {transform_indices = @transform_7, window_bounds = array<i64: 1, 8, 1>}]} {
    %c0_i32 = arith.constant 0 : i32
    %0 = arith.cmpi eq, %arg1, %c0_i32 : i32
    %1 = arith.extui %0 : i1 to i32
    %c0_i32_0 = arith.constant 0 : i32
    %2 = arith.cmpi ne, %1, %c0_i32_0 : i32
    scf.if %2 {
      %cst_74 = arith.constant 0.000000e+00 : f32
      %89 = vector.broadcast %cst_74 : f32 to vector<8x1xf32>
      %c0_75 = arith.constant 0 : index
      %c0_76 = arith.constant 0 : index
      %c0_77 = arith.constant 0 : index
      %90 = vector.load %arg6[%c0_75, %c0_76, %c0_77] : memref<1x8x1xf32, #tpu.memory_space<vmem>>, vector<1x8x1xf32>
      %91 = vector.shape_cast %90 : vector<1x8x1xf32> to vector<8x1xf32>
      %92 = vector.shape_cast %89 : vector<8x1xf32> to vector<1x8x1xf32>
      tpu.vector_store %arg6[%c0_75, %c0_76, %c0_77], %92 {strides = array<i32>} : memref<1x8x1xf32, #tpu.memory_space<vmem>>, vector<1x8x1xf32>,
      %cst_78 = arith.constant 0.000000e+00 : f32
      %93 = vector.broadcast %cst_78 : f32 to vector<8x1xf32>
      %c0_79 = arith.constant 0 : index
      %c0_80 = arith.constant 0 : index
      %c0_81 = arith.constant 0 : index
      %94 = vector.load %arg7[%c0_79, %c0_80, %c0_81] : memref<1x8x1xf32, #tpu.memory_space<vmem>>, vector<1x8x1xf32>
      %95 = vector.shape_cast %94 : vector<1x8x1xf32> to vector<8x1xf32>
      %96 = vector.shape_cast %93 : vector<8x1xf32> to vector<1x8x1xf32>
      tpu.vector_store %arg7[%c0_79, %c0_80, %c0_81], %96 {strides = array<i32>} : memref<1x8x1xf32, #tpu.memory_space<vmem>>, vector<1x8x1xf32>,
      %cst_82 = arith.constant 0.000000e+00 : f32
      %97 = vector.broadcast %cst_82 : f32 to vector<8x1xf32>
      %c0_83 = arith.constant 0 : index
      %c0_84 = arith.constant 0 : index
      %c0_85 = arith.constant 0 : index
      %98 = vector.load %arg8[%c0_83, %c0_84, %c0_85] : memref<1x8x1xf32, #tpu.memory_space<vmem>>, vector<1x8x1xf32>
      %99 = vector.shape_cast %98 : vector<1x8x1xf32> to vector<8x1xf32>
      %100 = vector.shape_cast %97 : vector<8x1xf32> to vector<1x8x1xf32>
      tpu.vector_store %arg8[%c0_83, %c0_84, %c0_85], %100 {strides = array<i32>} : memref<1x8x1xf32, #tpu.memory_space<vmem>>, vector<1x8x1xf32>,
      %cst_86 = arith.constant 0.000000e+00 : f32
      %101 = vector.broadcast %cst_86 : f32 to vector<8x1xf32>
      %c0_87 = arith.constant 0 : index
      %c0_88 = arith.constant 0 : index
      %c0_89 = arith.constant 0 : index
      %102 = vector.load %arg9[%c0_87, %c0_88, %c0_89] : memref<1x8x1xf32, #tpu.memory_space<vmem>>, vector<1x8x1xf32>
      %103 = vector.shape_cast %102 : vector<1x8x1xf32> to vector<8x1xf32>
      %104 = vector.shape_cast %101 : vector<8x1xf32> to vector<1x8x1xf32>
      tpu.vector_store %arg9[%c0_87, %c0_88, %c0_89], %104 {strides = array<i32>} : memref<1x8x1xf32, #tpu.memory_space<vmem>>, vector<1x8x1xf32>,
    } else {
    }
    %c0 = arith.constant 0 : index
    %c0_1 = arith.constant 0 : index
    %3 = vector.load %arg4[%c0, %c0_1] : memref<8x4xbf16, #tpu.memory_space<vmem>>, vector<8x4xbf16>
    %c0_2 = arith.constant 0 : index
    %c0_3 = arith.constant 0 : index
    %4 = vector.load %arg5[%c0_2, %c0_3] : memref<8x4xbf16, #tpu.memory_space<vmem>>, vector<8x4xbf16>
    %c0_4 = arith.constant 0 : index
    %c0_5 = arith.constant 0 : index
    %c0_6 = arith.constant 0 : index
    %5 = vector.load %arg2[%c0_4, %c0_5, %c0_6] : memref<2x4x256xf32, #tpu.memory_space<vmem>>, vector<1x4x256xf32>
    %6 = vector.shape_cast %5 : vector<1x4x256xf32> to vector<4x256xf32>
    %7 = arith.truncf %6 : vector<4x256xf32> to vector<4x256xbf16>
    %cst = arith.constant dense<0.000000e+00> : vector<8x256xf32>
    %8 = tpu.matmul %3, %7, %cst {dimension_numbers = #tpu.dot_dimension_numbers<[1], [0], [0], [1], [0, 0, 1, 1], [], []>} : vector<8x4xbf16>, vector<4x256xbf16>, vector<8x256xf32> -> vector<8x256xf32>
    %c0_7 = arith.constant 0 : index
    %c0_8 = arith.constant 0 : index
    %c0_9 = arith.constant 0 : index
    %9 = vector.load %arg3[%c0_7, %c0_8, %c0_9] : memref<2x4x256xf32, #tpu.memory_space<vmem>>, vector<1x4x256xf32>
    %10 = vector.shape_cast %9 : vector<1x4x256xf32> to vector<4x256xf32>
    %11 = arith.truncf %10 : vector<4x256xf32> to vector<4x256xbf16>
    %cst_10 = arith.constant dense<0.000000e+00> : vector<8x256xf32>
    %12 = tpu.matmul %4, %11, %cst_10 {dimension_numbers = #tpu.dot_dimension_numbers<[1], [0], [0], [1], [0, 0, 1, 1], [], []>} : vector<8x4xbf16>, vector<4x256xbf16>, vector<8x256xf32> -> vector<8x256xf32>
    %c0_11 = arith.constant 0 : index
    %c0_12 = arith.constant 0 : index
    %c0_13 = arith.constant 0 : index
    %13 = vector.load %arg6[%c0_11, %c0_12, %c0_13] : memref<1x8x1xf32, #tpu.memory_space<vmem>>, vector<1x8x1xf32>
    %14 = vector.shape_cast %13 : vector<1x8x1xf32> to vector<8x1xf32>
    %cst_14 = arith.constant dense<0.000000e+00> : vector<8xf32>
    %15 = vector.multi_reduction <add>, %8, %cst_14 [1] : vector<8x256xf32> to vector<8xf32>
    %16 = vector.shape_cast %15 : vector<8xf32> to vector<8x1xf32>
    %17 = arith.addf %14, %16 : vector<8x1xf32>
    %c0_15 = arith.constant 0 : index
    %c0_16 = arith.constant 0 : index
    %c0_17 = arith.constant 0 : index
    %18 = vector.load %arg6[%c0_15, %c0_16, %c0_17] : memref<1x8x1xf32, #tpu.memory_space<vmem>>, vector<1x8x1xf32>
    %19 = vector.shape_cast %18 : vector<1x8x1xf32> to vector<8x1xf32>
    %20 = vector.shape_cast %17 : vector<8x1xf32> to vector<1x8x1xf32>
    tpu.vector_store %arg6[%c0_15, %c0_16, %c0_17], %20 {strides = array<i32>} : memref<1x8x1xf32, #tpu.memory_space<vmem>>, vector<1x8x1xf32>,
    %c0_18 = arith.constant 0 : index
    %c0_19 = arith.constant 0 : index
    %c0_20 = arith.constant 0 : index
    %21 = vector.load %arg7[%c0_18, %c0_19, %c0_20] : memref<1x8x1xf32, #tpu.memory_space<vmem>>, vector<1x8x1xf32>
    %22 = vector.shape_cast %21 : vector<1x8x1xf32> to vector<8x1xf32>
    %23 = arith.mulf %8, %8 : vector<8x256xf32>
    %cst_21 = arith.constant dense<0.000000e+00> : vector<8xf32>
    %24 = vector.multi_reduction <add>, %23, %cst_21 [1] : vector<8x256xf32> to vector<8xf32>
    %25 = vector.shape_cast %24 : vector<8xf32> to vector<8x1xf32>
    %26 = arith.addf %22, %25 : vector<8x1xf32>
    %c0_22 = arith.constant 0 : index
    %c0_23 = arith.constant 0 : index
    %c0_24 = arith.constant 0 : index
    %27 = vector.load %arg7[%c0_22, %c0_23, %c0_24] : memref<1x8x1xf32, #tpu.memory_space<vmem>>, vector<1x8x1xf32>
    %28 = vector.shape_cast %27 : vector<1x8x1xf32> to vector<8x1xf32>
    %29 = vector.shape_cast %26 : vector<8x1xf32> to vector<1x8x1xf32>
    tpu.vector_store %arg7[%c0_22, %c0_23, %c0_24], %29 {strides = array<i32>} : memref<1x8x1xf32, #tpu.memory_space<vmem>>, vector<1x8x1xf32>,
    %c0_25 = arith.constant 0 : index
    %c0_26 = arith.constant 0 : index
    %c0_27 = arith.constant 0 : index
    %30 = vector.load %arg8[%c0_25, %c0_26, %c0_27] : memref<1x8x1xf32, #tpu.memory_space<vmem>>, vector<1x8x1xf32>
    %31 = vector.shape_cast %30 : vector<1x8x1xf32> to vector<8x1xf32>
    %cst_28 = arith.constant dense<0.000000e+00> : vector<8xf32>
    %32 = vector.multi_reduction <add>, %12, %cst_28 [1] : vector<8x256xf32> to vector<8xf32>
    %33 = vector.shape_cast %32 : vector<8xf32> to vector<8x1xf32>
    %34 = arith.addf %31, %33 : vector<8x1xf32>
    %c0_29 = arith.constant 0 : index
    %c0_30 = arith.constant 0 : index
    %c0_31 = arith.constant 0 : index
    %35 = vector.load %arg8[%c0_29, %c0_30, %c0_31] : memref<1x8x1xf32, #tpu.memory_space<vmem>>, vector<1x8x1xf32>
    %36 = vector.shape_cast %35 : vector<1x8x1xf32> to vector<8x1xf32>
    %37 = vector.shape_cast %34 : vector<8x1xf32> to vector<1x8x1xf32>
    tpu.vector_store %arg8[%c0_29, %c0_30, %c0_31], %37 {strides = array<i32>} : memref<1x8x1xf32, #tpu.memory_space<vmem>>, vector<1x8x1xf32>,
    %c0_32 = arith.constant 0 : index
    %c0_33 = arith.constant 0 : index
    %c0_34 = arith.constant 0 : index
    %38 = vector.load %arg9[%c0_32, %c0_33, %c0_34] : memref<1x8x1xf32, #tpu.memory_space<vmem>>, vector<1x8x1xf32>
    %39 = vector.shape_cast %38 : vector<1x8x1xf32> to vector<8x1xf32>
    %40 = arith.mulf %12, %12 : vector<8x256xf32>
    %cst_35 = arith.constant dense<0.000000e+00> : vector<8xf32>
    %41 = vector.multi_reduction <add>, %40, %cst_35 [1] : vector<8x256xf32> to vector<8xf32>
    %42 = vector.shape_cast %41 : vector<8xf32> to vector<8x1xf32>
    %43 = arith.addf %39, %42 : vector<8x1xf32>
    %c0_36 = arith.constant 0 : index
    %c0_37 = arith.constant 0 : index
    %c0_38 = arith.constant 0 : index
    %44 = vector.load %arg9[%c0_36, %c0_37, %c0_38] : memref<1x8x1xf32, #tpu.memory_space<vmem>>, vector<1x8x1xf32>
    %45 = vector.shape_cast %44 : vector<1x8x1xf32> to vector<8x1xf32>
    %46 = vector.shape_cast %43 : vector<8x1xf32> to vector<1x8x1xf32>
    tpu.vector_store %arg9[%c0_36, %c0_37, %c0_38], %46 {strides = array<i32>} : memref<1x8x1xf32, #tpu.memory_space<vmem>>, vector<1x8x1xf32>,
    %c1 = arith.constant 1 : index
    %c0_39 = arith.constant 0 : index
    %c0_40 = arith.constant 0 : index
    %47 = vector.load %arg2[%c1, %c0_39, %c0_40] : memref<2x4x256xf32, #tpu.memory_space<vmem>>, vector<1x4x256xf32>
    %48 = vector.shape_cast %47 : vector<1x4x256xf32> to vector<4x256xf32>
    %49 = arith.truncf %48 : vector<4x256xf32> to vector<4x256xbf16>
    %cst_41 = arith.constant dense<0.000000e+00> : vector<8x256xf32>
    %50 = tpu.matmul %3, %49, %cst_41 {dimension_numbers = #tpu.dot_dimension_numbers<[1], [0], [0], [1], [0, 0, 1, 1], [], []>} : vector<8x4xbf16>, vector<4x256xbf16>, vector<8x256xf32> -> vector<8x256xf32>
    %c1_42 = arith.constant 1 : index
    %c0_43 = arith.constant 0 : index
    %c0_44 = arith.constant 0 : index
    %51 = vector.load %arg3[%c1_42, %c0_43, %c0_44] : memref<2x4x256xf32, #tpu.memory_space<vmem>>, vector<1x4x256xf32>
    %52 = vector.shape_cast %51 : vector<1x4x256xf32> to vector<4x256xf32>
    %53 = arith.truncf %52 : vector<4x256xf32> to vector<4x256xbf16>
    %cst_45 = arith.constant dense<0.000000e+00> : vector<8x256xf32>
    %54 = tpu.matmul %4, %53, %cst_45 {dimension_numbers = #tpu.dot_dimension_numbers<[1], [0], [0], [1], [0, 0, 1, 1], [], []>} : vector<8x4xbf16>, vector<4x256xbf16>, vector<8x256xf32> -> vector<8x256xf32>
    %c0_46 = arith.constant 0 : index
    %c0_47 = arith.constant 0 : index
    %c0_48 = arith.constant 0 : index
    %55 = vector.load %arg6[%c0_46, %c0_47, %c0_48] : memref<1x8x1xf32, #tpu.memory_space<vmem>>, vector<1x8x1xf32>
    %56 = vector.shape_cast %55 : vector<1x8x1xf32> to vector<8x1xf32>
    %cst_49 = arith.constant dense<0.000000e+00> : vector<8xf32>
    %57 = vector.multi_reduction <add>, %50, %cst_49 [1] : vector<8x256xf32> to vector<8xf32>
    %58 = vector.shape_cast %57 : vector<8xf32> to vector<8x1xf32>
    %59 = arith.addf %56, %58 : vector<8x1xf32>
    %c0_50 = arith.constant 0 : index
    %c0_51 = arith.constant 0 : index
    %c0_52 = arith.constant 0 : index
    %60 = vector.load %arg6[%c0_50, %c0_51, %c0_52] : memref<1x8x1xf32, #tpu.memory_space<vmem>>, vector<1x8x1xf32>
    %61 = vector.shape_cast %60 : vector<1x8x1xf32> to vector<8x1xf32>
    %62 = vector.shape_cast %59 : vector<8x1xf32> to vector<1x8x1xf32>
    tpu.vector_store %arg6[%c0_50, %c0_51, %c0_52], %62 {strides = array<i32>} : memref<1x8x1xf32, #tpu.memory_space<vmem>>, vector<1x8x1xf32>,
    %c0_53 = arith.constant 0 : index
    %c0_54 = arith.constant 0 : index
    %c0_55 = arith.constant 0 : index
    %63 = vector.load %arg7[%c0_53, %c0_54, %c0_55] : memref<1x8x1xf32, #tpu.memory_space<vmem>>, vector<1x8x1xf32>
    %64 = vector.shape_cast %63 : vector<1x8x1xf32> to vector<8x1xf32>
    %65 = arith.mulf %50, %50 : vector<8x256xf32>
    %cst_56 = arith.constant dense<0.000000e+00> : vector<8xf32>
    %66 = vector.multi_reduction <add>, %65, %cst_56 [1] : vector<8x256xf32> to vector<8xf32>
    %67 = vector.shape_cast %66 : vector<8xf32> to vector<8x1xf32>
    %68 = arith.addf %64, %67 : vector<8x1xf32>
    %c0_57 = arith.constant 0 : index
    %c0_58 = arith.constant 0 : index
    %c0_59 = arith.constant 0 : index
    %69 = vector.load %arg7[%c0_57, %c0_58, %c0_59] : memref<1x8x1xf32, #tpu.memory_space<vmem>>, vector<1x8x1xf32>
    %70 = vector.shape_cast %69 : vector<1x8x1xf32> to vector<8x1xf32>
    %71 = vector.shape_cast %68 : vector<8x1xf32> to vector<1x8x1xf32>
    tpu.vector_store %arg7[%c0_57, %c0_58, %c0_59], %71 {strides = array<i32>} : memref<1x8x1xf32, #tpu.memory_space<vmem>>, vector<1x8x1xf32>,
    %c0_60 = arith.constant 0 : index
    %c0_61 = arith.constant 0 : index
    %c0_62 = arith.constant 0 : index
    %72 = vector.load %arg8[%c0_60, %c0_61, %c0_62] : memref<1x8x1xf32, #tpu.memory_space<vmem>>, vector<1x8x1xf32>
    %73 = vector.shape_cast %72 : vector<1x8x1xf32> to vector<8x1xf32>
    %cst_63 = arith.constant dense<0.000000e+00> : vector<8xf32>
    %74 = vector.multi_reduction <add>, %54, %cst_63 [1] : vector<8x256xf32> to vector<8xf32>
    %75 = vector.shape_cast %74 : vector<8xf32> to vector<8x1xf32>
    %76 = arith.addf %73, %75 : vector<8x1xf32>
    %c0_64 = arith.constant 0 : index
    %c0_65 = arith.constant 0 : index
    %c0_66 = arith.constant 0 : index
    %77 = vector.load %arg8[%c0_64, %c0_65, %c0_66] : memref<1x8x1xf32, #tpu.memory_space<vmem>>, vector<1x8x1xf32>
    %78 = vector.shape_cast %77 : vector<1x8x1xf32> to vector<8x1xf32>
    %79 = vector.shape_cast %76 : vector<8x1xf32> to vector<1x8x1xf32>
    tpu.vector_store %arg8[%c0_64, %c0_65, %c0_66], %79 {strides = array<i32>} : memref<1x8x1xf32, #tpu.memory_space<vmem>>, vector<1x8x1xf32>,
    %c0_67 = arith.constant 0 : index
    %c0_68 = arith.constant 0 : index
    %c0_69 = arith.constant 0 : index
    %80 = vector.load %arg9[%c0_67, %c0_68, %c0_69] : memref<1x8x1xf32, #tpu.memory_space<vmem>>, vector<1x8x1xf32>
    %81 = vector.shape_cast %80 : vector<1x8x1xf32> to vector<8x1xf32>
    %82 = arith.mulf %54, %54 : vector<8x256xf32>
    %cst_70 = arith.constant dense<0.000000e+00> : vector<8xf32>
    %83 = vector.multi_reduction <add>, %82, %cst_70 [1] : vector<8x256xf32> to vector<8xf32>
    %84 = vector.shape_cast %83 : vector<8xf32> to vector<8x1xf32>
    %85 = arith.addf %81, %84 : vector<8x1xf32>
    %c0_71 = arith.constant 0 : index
    %c0_72 = arith.constant 0 : index
    %c0_73 = arith.constant 0 : index
    %86 = vector.load %arg9[%c0_71, %c0_72, %c0_73] : memref<1x8x1xf32, #tpu.memory_space<vmem>>, vector<1x8x1xf32>
    %87 = vector.shape_cast %86 : vector<1x8x1xf32> to vector<8x1xf32>
    %88 = vector.shape_cast %85 : vector<8x1xf32> to vector<1x8x1xf32>
    tpu.vector_store %arg9[%c0_71, %c0_72, %c0_73], %88 {strides = array<i32>} : memref<1x8x1xf32, #tpu.memory_space<vmem>>, vector<1x8x1xf32>,
    return
  }
  func.func @transform_0(%arg0: i32, %arg1: i32) -> (i32, i32, i32) {
    %c0_i32 = arith.constant 0 : i32
    %c0_i32_0 = arith.constant 0 : i32
    return %arg0, %c0_i32, %arg1 : i32, i32, i32
  }
  func.func @transform_1(%arg0: i32, %arg1: i32) -> (i32, i32, i32) {
    %c0_i32 = arith.constant 0 : i32
    %c0_i32_0 = arith.constant 0 : i32
    return %arg0, %c0_i32, %arg1 : i32, i32, i32
  }
  func.func @transform_2(%arg0: i32, %arg1: i32) -> (i32, i32) {
    %c0_i32 = arith.constant 0 : i32
    %c0_i32_0 = arith.constant 0 : i32
    %c0_i32_1 = arith.constant 0 : i32
    return %c0_i32, %c0_i32_0 : i32, i32
  }
  func.func @transform_3(%arg0: i32, %arg1: i32) -> (i32, i32) {
    %c0_i32 = arith.constant 0 : i32
    %c0_i32_0 = arith.constant 0 : i32
    %c0_i32_1 = arith.constant 0 : i32
    return %c0_i32, %c0_i32_0 : i32, i32
  }
  func.func @transform_4(%arg0: i32, %arg1: i32) -> (i32, i32, i32) {
    %c0_i32 = arith.constant 0 : i32
    %c0_i32_0 = arith.constant 0 : i32
    %c0_i32_1 = arith.constant 0 : i32
    return %arg0, %c0_i32, %c0_i32_0 : i32, i32, i32
  }
  func.func @transform_5(%arg0: i32, %arg1: i32) -> (i32, i32, i32) {
    %c0_i32 = arith.constant 0 : i32
    %c0_i32_0 = arith.constant 0 : i32
    %c0_i32_1 = arith.constant 0 : i32
    return %arg0, %c0_i32, %c0_i32_0 : i32, i32, i32
  }
  func.func @transform_6(%arg0: i32, %arg1: i32) -> (i32, i32, i32) {
    %c0_i32 = arith.constant 0 : i32
    %c0_i32_0 = arith.constant 0 : i32
    %c0_i32_1 = arith.constant 0 : i32
    return %arg0, %c0_i32, %c0_i32_0 : i32, i32, i32
  }
  func.func @transform_7(%arg0: i32, %arg1: i32) -> (i32, i32, i32) {
    %c0_i32 = arith.constant 0 : i32
    %c0_i32_0 = arith.constant 0 : i32
    %c0_i32_1 = arith.constant 0 : i32
    return %arg0, %c0_i32, %c0_i32_0 : i32, i32, i32
  }
}

module attributes {stable_mosaic.version = 11 : i64} {
  func.func @_apply_kernel(%arg0: i32, %arg1: i32, %arg2: memref<2x4x256xf32, #tpu.memory_space<vmem>>, %arg3: memref<2x1x256xf32, #tpu.memory_space<vmem>>, %arg4: memref<2xf32, #tpu.memory_space<smem>>, %arg5: memref<2x4x256xf32, #tpu.memory_space<vmem>>) attributes {dimension_semantics = [#tpu.dimension_semantics<parallel>, #tpu.dimension_semantics<parallel>], iteration_bounds = array<i64: 1, 1>, scalar_prefetch = 0 : i64, scratch_operands = 0 : i64, tpu.core_type = #tpu.core_type<tc>, window_params = [{transform_indices = @transform_0, window_bounds = array<i64: 2, 4, 256>}, {transform_indices = @transform_1, window_bounds = array<i64: 2, 1, 256>}, {transform_indices = @transform_2, window_bounds = array<i64: 2>}, {transform_indices = @transform_3, window_bounds = array<i64: 2, 4, 256>}]} {
    %c0 = arith.constant 0 : index
    %0 = memref.load %arg4[%c0] : memref<2xf32, #tpu.memory_space<smem>>
    %c1 = arith.constant 1 : index
    %1 = memref.load %arg4[%c1] : memref<2xf32, #tpu.memory_space<smem>>
    %c0_0 = arith.constant 0 : index
    %c0_1 = arith.constant 0 : index
    %c0_2 = arith.constant 0 : index
    %2 = vector.load %arg3[%c0_0, %c0_1, %c0_2] : memref<2x1x256xf32, #tpu.memory_space<vmem>>, vector<1x1x256xf32>
    %3 = vector.shape_cast %2 : vector<1x1x256xf32> to vector<1x256xf32>
    %4 = vector.broadcast %0 : f32 to vector<1x256xf32>
    %5 = arith.mulf %4, %3 : vector<1x256xf32>
    %6 = vector.broadcast %1 : f32 to vector<1x256xf32>
    %7 = arith.addf %5, %6 : vector<1x256xf32>
    %8 = arith.negf %7 : vector<1x256xf32>
    %9 = math.exp %8 : vector<1x256xf32>
    %cst = arith.constant 1.000000e+00 : f32
    %10 = vector.broadcast %cst : f32 to vector<1x256xf32>
    %11 = arith.addf %10, %9 : vector<1x256xf32>
    %12 = arith.divf %10, %11 : vector<1x256xf32>
    %c0_3 = arith.constant 0 : index
    %c0_4 = arith.constant 0 : index
    %c0_5 = arith.constant 0 : index
    %13 = vector.load %arg2[%c0_3, %c0_4, %c0_5] : memref<2x4x256xf32, #tpu.memory_space<vmem>>, vector<1x4x256xf32>
    %14 = vector.shape_cast %13 : vector<1x4x256xf32> to vector<4x256xf32>
    %15 = vector.broadcast %12 : vector<1x256xf32> to vector<4x256xf32>
    %16 = arith.mulf %14, %15 : vector<4x256xf32>
    %c0_6 = arith.constant 0 : index
    %c0_7 = arith.constant 0 : index
    %c0_8 = arith.constant 0 : index
    %17 = vector.load %arg5[%c0_6, %c0_7, %c0_8] : memref<2x4x256xf32, #tpu.memory_space<vmem>>, vector<1x4x256xf32>
    %18 = vector.shape_cast %17 : vector<1x4x256xf32> to vector<4x256xf32>
    %19 = vector.shape_cast %16 : vector<4x256xf32> to vector<1x4x256xf32>
    tpu.vector_store %arg5[%c0_6, %c0_7, %c0_8], %19 {strides = array<i32>} : memref<2x4x256xf32, #tpu.memory_space<vmem>>, vector<1x4x256xf32>,
    %c1_9 = arith.constant 1 : index
    %c0_10 = arith.constant 0 : index
    %c0_11 = arith.constant 0 : index
    %20 = vector.load %arg3[%c1_9, %c0_10, %c0_11] : memref<2x1x256xf32, #tpu.memory_space<vmem>>, vector<1x1x256xf32>
    %21 = vector.shape_cast %20 : vector<1x1x256xf32> to vector<1x256xf32>
    %22 = vector.broadcast %0 : f32 to vector<1x256xf32>
    %23 = arith.mulf %22, %21 : vector<1x256xf32>
    %24 = vector.broadcast %1 : f32 to vector<1x256xf32>
    %25 = arith.addf %23, %24 : vector<1x256xf32>
    %26 = arith.negf %25 : vector<1x256xf32>
    %27 = math.exp %26 : vector<1x256xf32>
    %cst_12 = arith.constant 1.000000e+00 : f32
    %28 = vector.broadcast %cst_12 : f32 to vector<1x256xf32>
    %29 = arith.addf %28, %27 : vector<1x256xf32>
    %30 = arith.divf %28, %29 : vector<1x256xf32>
    %c1_13 = arith.constant 1 : index
    %c0_14 = arith.constant 0 : index
    %c0_15 = arith.constant 0 : index
    %31 = vector.load %arg2[%c1_13, %c0_14, %c0_15] : memref<2x4x256xf32, #tpu.memory_space<vmem>>, vector<1x4x256xf32>
    %32 = vector.shape_cast %31 : vector<1x4x256xf32> to vector<4x256xf32>
    %33 = vector.broadcast %30 : vector<1x256xf32> to vector<4x256xf32>
    %34 = arith.mulf %32, %33 : vector<4x256xf32>
    %c1_16 = arith.constant 1 : index
    %c0_17 = arith.constant 0 : index
    %c0_18 = arith.constant 0 : index
    %35 = vector.load %arg5[%c1_16, %c0_17, %c0_18] : memref<2x4x256xf32, #tpu.memory_space<vmem>>, vector<1x4x256xf32>
    %36 = vector.shape_cast %35 : vector<1x4x256xf32> to vector<4x256xf32>
    %37 = vector.shape_cast %34 : vector<4x256xf32> to vector<1x4x256xf32>
    tpu.vector_store %arg5[%c1_16, %c0_17, %c0_18], %37 {strides = array<i32>} : memref<2x4x256xf32, #tpu.memory_space<vmem>>, vector<1x4x256xf32>,
    return
  }
  func.func @transform_0(%arg0: i32, %arg1: i32) -> (i32, i32, i32) {
    %c0_i32 = arith.constant 0 : i32
    %c0_i32_0 = arith.constant 0 : i32
    return %arg0, %c0_i32, %arg1 : i32, i32, i32
  }
  func.func @transform_1(%arg0: i32, %arg1: i32) -> (i32, i32, i32) {
    %c0_i32 = arith.constant 0 : i32
    %c0_i32_0 = arith.constant 0 : i32
    return %arg0, %c0_i32, %arg1 : i32, i32, i32
  }
  func.func @transform_2(%arg0: i32, %arg1: i32) -> i32 {
    %c0_i32 = arith.constant 0 : i32
    %c0_i32_0 = arith.constant 0 : i32
    return %c0_i32 : i32
  }
  func.func @transform_3(%arg0: i32, %arg1: i32) -> (i32, i32, i32) {
    %c0_i32 = arith.constant 0 : i32
    %c0_i32_0 = arith.constant 0 : i32
    return %arg0, %c0_i32, %arg1 : i32, i32, i32
  }
}

module attributes {stable_mosaic.version = 11 : i64} {
  func.func @_gate_recompute_kernel(%arg0: i32, %arg1: i32, %arg2: memref<2x4x256xf32, #tpu.memory_space<vmem>>, %arg3: memref<2x4x256xf32, #tpu.memory_space<vmem>>, %arg4: memref<8x4xbf16, #tpu.memory_space<vmem>>, %arg5: memref<8x4xbf16, #tpu.memory_space<vmem>>, %arg6: memref<8x1xf32, #tpu.memory_space<vmem>>, %arg7: memref<1x8xf32, #tpu.memory_space<vmem>>, %arg8: memref<2x1x256xf32, #tpu.memory_space<vmem>>, %arg9: memref<1x1x1xf32, #tpu.memory_space<vmem>>, %arg10: memref<1x1x1xf32, #tpu.memory_space<vmem>>) attributes {dimension_semantics = [#tpu.dimension_semantics<parallel>, #tpu.dimension_semantics<arbitrary>], iteration_bounds = array<i64: 1, 1>, scalar_prefetch = 0 : i64, scratch_operands = 0 : i64, tpu.core_type = #tpu.core_type<tc>, window_params = [{transform_indices = @transform_0, window_bounds = array<i64: 2, 4, 256>}, {transform_indices = @transform_1, window_bounds = array<i64: 2, 4, 256>}, {pipeline_mode = #tpu.pipeline_mode<synchronous>, transform_indices = @transform_2, window_bounds = array<i64: 8, 4>}, {pipeline_mode = #tpu.pipeline_mode<synchronous>, transform_indices = @transform_3, window_bounds = array<i64: 8, 4>}, {pipeline_mode = #tpu.pipeline_mode<synchronous>, transform_indices = @transform_4, window_bounds = array<i64: 8, 1>}, {pipeline_mode = #tpu.pipeline_mode<synchronous>, transform_indices = @transform_5, window_bounds = array<i64: 1, 8>}, {transform_indices = @transform_6, window_bounds = array<i64: 2, 1, 256>}, {transform_indices = @transform_7, window_bounds = array<i64: 1, 1, 1>}, {transform_indices = @transform_8, window_bounds = array<i64: 1, 1, 1>}]} {
    %c0_i32 = arith.constant 0 : i32
    %0 = arith.cmpi eq, %arg1, %c0_i32 : i32
    %1 = arith.extui %0 : i1 to i32
    %c0_i32_0 = arith.constant 0 : i32
    %2 = arith.cmpi ne, %1, %c0_i32_0 : i32
    scf.if %2 {
      %cst_60 = arith.constant 0.000000e+00 : f32
      %75 = vector.broadcast %cst_60 : f32 to vector<1x1xf32>
      %c0_61 = arith.constant 0 : index
      %c0_62 = arith.constant 0 : index
      %c0_63 = arith.constant 0 : index
      %76 = vector.load %arg9[%c0_61, %c0_62, %c0_63] : memref<1x1x1xf32, #tpu.memory_space<vmem>>, vector<1x1x1xf32>
      %77 = vector.shape_cast %76 : vector<1x1x1xf32> to vector<1x1xf32>
      %78 = vector.shape_cast %75 : vector<1x1xf32> to vector<1x1x1xf32>
      tpu.vector_store %arg9[%c0_61, %c0_62, %c0_63], %78 {strides = array<i32>} : memref<1x1x1xf32, #tpu.memory_space<vmem>>, vector<1x1x1xf32>,
      %cst_64 = arith.constant 0.000000e+00 : f32
      %79 = vector.broadcast %cst_64 : f32 to vector<1x1xf32>
      %c0_65 = arith.constant 0 : index
      %c0_66 = arith.constant 0 : index
      %c0_67 = arith.constant 0 : index
      %80 = vector.load %arg10[%c0_65, %c0_66, %c0_67] : memref<1x1x1xf32, #tpu.memory_space<vmem>>, vector<1x1x1xf32>
      %81 = vector.shape_cast %80 : vector<1x1x1xf32> to vector<1x1xf32>
      %82 = vector.shape_cast %79 : vector<1x1xf32> to vector<1x1x1xf32>
      tpu.vector_store %arg10[%c0_65, %c0_66, %c0_67], %82 {strides = array<i32>} : memref<1x1x1xf32, #tpu.memory_space<vmem>>, vector<1x1x1xf32>,
    } else {
    }
    %c0 = arith.constant 0 : index
    %c0_1 = arith.constant 0 : index
    %3 = vector.load %arg4[%c0, %c0_1] : memref<8x4xbf16, #tpu.memory_space<vmem>>, vector<8x4xbf16>
    %c0_2 = arith.constant 0 : index
    %c0_3 = arith.constant 0 : index
    %4 = vector.load %arg5[%c0_2, %c0_3] : memref<8x4xbf16, #tpu.memory_space<vmem>>, vector<8x4xbf16>
    %c0_4 = arith.constant 0 : index
    %c0_5 = arith.constant 0 : index
    %5 = vector.load %arg6[%c0_4, %c0_5] : memref<8x1xf32, #tpu.memory_space<vmem>>, vector<8x1xf32>
    %c0_6 = arith.constant 0 : index
    %c0_7 = arith.constant 0 : index
    %6 = vector.load %arg7[%c0_6, %c0_7] : memref<1x8xf32, #tpu.memory_space<vmem>>, vector<1x8xf32>
    %c0_8 = arith.constant 0 : index
    %c0_9 = arith.constant 0 : index
    %c0_10 = arith.constant 0 : index
    %7 = vector.load %arg2[%c0_8, %c0_9, %c0_10] : memref<2x4x256xf32, #tpu.memory_space<vmem>>, vector<1x4x256xf32>
    %8 = vector.shape_cast %7 : vector<1x4x256xf32> to vector<4x256xf32>
    %9 = arith.truncf %8 : vector<4x256xf32> to vector<4x256xbf16>
    %cst = arith.constant dense<0.000000e+00> : vector<8x256xf32>
    %10 = tpu.matmul %3, %9, %cst {dimension_numbers = #tpu.dot_dimension_numbers<[1], [0], [0], [1], [0, 0, 1, 1], [], []>} : vector<8x4xbf16>, vector<4x256xbf16>, vector<8x256xf32> -> vector<8x256xf32>
    %c0_11 = arith.constant 0 : index
    %c0_12 = arith.constant 0 : index
    %c0_13 = arith.constant 0 : index
    %11 = vector.load %arg3[%c0_11, %c0_12, %c0_13] : memref<2x4x256xf32, #tpu.memory_space<vmem>>, vector<1x4x256xf32>
    %12 = vector.shape_cast %11 : vector<1x4x256xf32> to vector<4x256xf32>
    %13 = arith.truncf %12 : vector<4x256xf32> to vector<4x256xbf16>
    %cst_14 = arith.constant dense<0.000000e+00> : vector<8x256xf32>
    %14 = tpu.matmul %4, %13, %cst_14 {dimension_numbers = #tpu.dot_dimension_numbers<[1], [0], [0], [1], [0, 0, 1, 1], [], []>} : vector<8x4xbf16>, vector<4x256xbf16>, vector<8x256xf32> -> vector<8x256xf32>
    %15 = arith.addf %10, %14 : vector<8x256xf32>
    %16 = vector.broadcast %5 : vector<8x1xf32> to vector<8x256xf32>
    %17 = arith.addf %15, %16 : vector<8x256xf32>
    %cst_15 = arith.constant 0.000000e+00 : f32
    %18 = vector.broadcast %cst_15 : f32 to vector<8x256xf32>
    %19 = arith.maximumf %17, %18 : vector<8x256xf32>
    %cst_16 = arith.constant dense<0.000000e+00> : vector<1x256xf32>
    %20 = tpu.matmul %6, %19, %cst_16 {dimension_numbers = #tpu.dot_dimension_numbers<[1], [0], [0], [1], [0, 0, 1, 1], [], []>} : vector<1x8xf32>, vector<8x256xf32>, vector<1x256xf32> -> vector<1x256xf32>
    %c0_17 = arith.constant 0 : index
    %c0_18 = arith.constant 0 : index
    %c0_19 = arith.constant 0 : index
    %21 = vector.load %arg8[%c0_17, %c0_18, %c0_19] : memref<2x1x256xf32, #tpu.memory_space<vmem>>, vector<1x1x256xf32>
    %22 = vector.shape_cast %21 : vector<1x1x256xf32> to vector<1x256xf32>
    %23 = vector.shape_cast %20 : vector<1x256xf32> to vector<1x1x256xf32>
    tpu.vector_store %arg8[%c0_17, %c0_18, %c0_19], %23 {strides = array<i32>} : memref<2x1x256xf32, #tpu.memory_space<vmem>>, vector<1x1x256xf32>,
    %c0_20 = arith.constant 0 : index
    %c0_21 = arith.constant 0 : index
    %c0_22 = arith.constant 0 : index
    %24 = vector.load %arg9[%c0_20, %c0_21, %c0_22] : memref<1x1x1xf32, #tpu.memory_space<vmem>>, vector<1x1x1xf32>
    %25 = vector.shape_cast %24 : vector<1x1x1xf32> to vector<1x1xf32>
    %cst_23 = arith.constant dense<0.000000e+00> : vector<1xf32>
    %26 = vector.multi_reduction <add>, %20, %cst_23 [1] : vector<1x256xf32> to vector<1xf32>
    %27 = vector.shape_cast %26 : vector<1xf32> to vector<1x1xf32>
    %28 = arith.addf %25, %27 : vector<1x1xf32>
    %c0_24 = arith.constant 0 : index
    %c0_25 = arith.constant 0 : index
    %c0_26 = arith.constant 0 : index
    %29 = vector.load %arg9[%c0_24, %c0_25, %c0_26] : memref<1x1x1xf32, #tpu.memory_space<vmem>>, vector<1x1x1xf32>
    %30 = vector.shape_cast %29 : vector<1x1x1xf32> to vector<1x1xf32>
    %31 = vector.shape_cast %28 : vector<1x1xf32> to vector<1x1x1xf32>
    tpu.vector_store %arg9[%c0_24, %c0_25, %c0_26], %31 {strides = array<i32>} : memref<1x1x1xf32, #tpu.memory_space<vmem>>, vector<1x1x1xf32>,
    %c0_27 = arith.constant 0 : index
    %c0_28 = arith.constant 0 : index
    %c0_29 = arith.constant 0 : index
    %32 = vector.load %arg10[%c0_27, %c0_28, %c0_29] : memref<1x1x1xf32, #tpu.memory_space<vmem>>, vector<1x1x1xf32>
    %33 = vector.shape_cast %32 : vector<1x1x1xf32> to vector<1x1xf32>
    %34 = arith.mulf %20, %20 : vector<1x256xf32>
    %cst_30 = arith.constant dense<0.000000e+00> : vector<1xf32>
    %35 = vector.multi_reduction <add>, %34, %cst_30 [1] : vector<1x256xf32> to vector<1xf32>
    %36 = vector.shape_cast %35 : vector<1xf32> to vector<1x1xf32>
    %37 = arith.addf %33, %36 : vector<1x1xf32>
    %c0_31 = arith.constant 0 : index
    %c0_32 = arith.constant 0 : index
    %c0_33 = arith.constant 0 : index
    %38 = vector.load %arg10[%c0_31, %c0_32, %c0_33] : memref<1x1x1xf32, #tpu.memory_space<vmem>>, vector<1x1x1xf32>
    %39 = vector.shape_cast %38 : vector<1x1x1xf32> to vector<1x1xf32>
    %40 = vector.shape_cast %37 : vector<1x1xf32> to vector<1x1x1xf32>
    tpu.vector_store %arg10[%c0_31, %c0_32, %c0_33], %40 {strides = array<i32>} : memref<1x1x1xf32, #tpu.memory_space<vmem>>, vector<1x1x1xf32>,
    %c1 = arith.constant 1 : index
    %c0_34 = arith.constant 0 : index
    %c0_35 = arith.constant 0 : index
    %41 = vector.load %arg2[%c1, %c0_34, %c0_35] : memref<2x4x256xf32, #tpu.memory_space<vmem>>, vector<1x4x256xf32>
    %42 = vector.shape_cast %41 : vector<1x4x256xf32> to vector<4x256xf32>
    %43 = arith.truncf %42 : vector<4x256xf32> to vector<4x256xbf16>
    %cst_36 = arith.constant dense<0.000000e+00> : vector<8x256xf32>
    %44 = tpu.matmul %3, %43, %cst_36 {dimension_numbers = #tpu.dot_dimension_numbers<[1], [0], [0], [1], [0, 0, 1, 1], [], []>} : vector<8x4xbf16>, vector<4x256xbf16>, vector<8x256xf32> -> vector<8x256xf32>
    %c1_37 = arith.constant 1 : index
    %c0_38 = arith.constant 0 : index
    %c0_39 = arith.constant 0 : index
    %45 = vector.load %arg3[%c1_37, %c0_38, %c0_39] : memref<2x4x256xf32, #tpu.memory_space<vmem>>, vector<1x4x256xf32>
    %46 = vector.shape_cast %45 : vector<1x4x256xf32> to vector<4x256xf32>
    %47 = arith.truncf %46 : vector<4x256xf32> to vector<4x256xbf16>
    %cst_40 = arith.constant dense<0.000000e+00> : vector<8x256xf32>
    %48 = tpu.matmul %4, %47, %cst_40 {dimension_numbers = #tpu.dot_dimension_numbers<[1], [0], [0], [1], [0, 0, 1, 1], [], []>} : vector<8x4xbf16>, vector<4x256xbf16>, vector<8x256xf32> -> vector<8x256xf32>
    %49 = arith.addf %44, %48 : vector<8x256xf32>
    %50 = vector.broadcast %5 : vector<8x1xf32> to vector<8x256xf32>
    %51 = arith.addf %49, %50 : vector<8x256xf32>
    %cst_41 = arith.constant 0.000000e+00 : f32
    %52 = vector.broadcast %cst_41 : f32 to vector<8x256xf32>
    %53 = arith.maximumf %51, %52 : vector<8x256xf32>
    %cst_42 = arith.constant dense<0.000000e+00> : vector<1x256xf32>
    %54 = tpu.matmul %6, %53, %cst_42 {dimension_numbers = #tpu.dot_dimension_numbers<[1], [0], [0], [1], [0, 0, 1, 1], [], []>} : vector<1x8xf32>, vector<8x256xf32>, vector<1x256xf32> -> vector<1x256xf32>
    %c1_43 = arith.constant 1 : index
    %c0_44 = arith.constant 0 : index
    %c0_45 = arith.constant 0 : index
    %55 = vector.load %arg8[%c1_43, %c0_44, %c0_45] : memref<2x1x256xf32, #tpu.memory_space<vmem>>, vector<1x1x256xf32>
    %56 = vector.shape_cast %55 : vector<1x1x256xf32> to vector<1x256xf32>
    %57 = vector.shape_cast %54 : vector<1x256xf32> to vector<1x1x256xf32>
    tpu.vector_store %arg8[%c1_43, %c0_44, %c0_45], %57 {strides = array<i32>} : memref<2x1x256xf32, #tpu.memory_space<vmem>>, vector<1x1x256xf32>,
    %c0_46 = arith.constant 0 : index
    %c0_47 = arith.constant 0 : index
    %c0_48 = arith.constant 0 : index
    %58 = vector.load %arg9[%c0_46, %c0_47, %c0_48] : memref<1x1x1xf32, #tpu.memory_space<vmem>>, vector<1x1x1xf32>
    %59 = vector.shape_cast %58 : vector<1x1x1xf32> to vector<1x1xf32>
    %cst_49 = arith.constant dense<0.000000e+00> : vector<1xf32>
    %60 = vector.multi_reduction <add>, %54, %cst_49 [1] : vector<1x256xf32> to vector<1xf32>
    %61 = vector.shape_cast %60 : vector<1xf32> to vector<1x1xf32>
    %62 = arith.addf %59, %61 : vector<1x1xf32>
    %c0_50 = arith.constant 0 : index
    %c0_51 = arith.constant 0 : index
    %c0_52 = arith.constant 0 : index
    %63 = vector.load %arg9[%c0_50, %c0_51, %c0_52] : memref<1x1x1xf32, #tpu.memory_space<vmem>>, vector<1x1x1xf32>
    %64 = vector.shape_cast %63 : vector<1x1x1xf32> to vector<1x1xf32>
    %65 = vector.shape_cast %62 : vector<1x1xf32> to vector<1x1x1xf32>
    tpu.vector_store %arg9[%c0_50, %c0_51, %c0_52], %65 {strides = array<i32>} : memref<1x1x1xf32, #tpu.memory_space<vmem>>, vector<1x1x1xf32>,
    %c0_53 = arith.constant 0 : index
    %c0_54 = arith.constant 0 : index
    %c0_55 = arith.constant 0 : index
    %66 = vector.load %arg10[%c0_53, %c0_54, %c0_55] : memref<1x1x1xf32, #tpu.memory_space<vmem>>, vector<1x1x1xf32>
    %67 = vector.shape_cast %66 : vector<1x1x1xf32> to vector<1x1xf32>
    %68 = arith.mulf %54, %54 : vector<1x256xf32>
    %cst_56 = arith.constant dense<0.000000e+00> : vector<1xf32>
    %69 = vector.multi_reduction <add>, %68, %cst_56 [1] : vector<1x256xf32> to vector<1xf32>
    %70 = vector.shape_cast %69 : vector<1xf32> to vector<1x1xf32>
    %71 = arith.addf %67, %70 : vector<1x1xf32>
    %c0_57 = arith.constant 0 : index
    %c0_58 = arith.constant 0 : index
    %c0_59 = arith.constant 0 : index
    %72 = vector.load %arg10[%c0_57, %c0_58, %c0_59] : memref<1x1x1xf32, #tpu.memory_space<vmem>>, vector<1x1x1xf32>
    %73 = vector.shape_cast %72 : vector<1x1x1xf32> to vector<1x1xf32>
    %74 = vector.shape_cast %71 : vector<1x1xf32> to vector<1x1x1xf32>
    tpu.vector_store %arg10[%c0_57, %c0_58, %c0_59], %74 {strides = array<i32>} : memref<1x1x1xf32, #tpu.memory_space<vmem>>, vector<1x1x1xf32>,
    return
  }
  func.func @transform_0(%arg0: i32, %arg1: i32) -> (i32, i32, i32) {
    %c0_i32 = arith.constant 0 : i32
    %c0_i32_0 = arith.constant 0 : i32
    return %arg0, %c0_i32, %arg1 : i32, i32, i32
  }
  func.func @transform_1(%arg0: i32, %arg1: i32) -> (i32, i32, i32) {
    %c0_i32 = arith.constant 0 : i32
    %c0_i32_0 = arith.constant 0 : i32
    return %arg0, %c0_i32, %arg1 : i32, i32, i32
  }
  func.func @transform_2(%arg0: i32, %arg1: i32) -> (i32, i32) {
    %c0_i32 = arith.constant 0 : i32
    %c0_i32_0 = arith.constant 0 : i32
    %c0_i32_1 = arith.constant 0 : i32
    return %c0_i32, %c0_i32_0 : i32, i32
  }
  func.func @transform_3(%arg0: i32, %arg1: i32) -> (i32, i32) {
    %c0_i32 = arith.constant 0 : i32
    %c0_i32_0 = arith.constant 0 : i32
    %c0_i32_1 = arith.constant 0 : i32
    return %c0_i32, %c0_i32_0 : i32, i32
  }
  func.func @transform_4(%arg0: i32, %arg1: i32) -> (i32, i32) {
    %c0_i32 = arith.constant 0 : i32
    %c0_i32_0 = arith.constant 0 : i32
    %c0_i32_1 = arith.constant 0 : i32
    return %c0_i32, %c0_i32_0 : i32, i32
  }
  func.func @transform_5(%arg0: i32, %arg1: i32) -> (i32, i32) {
    %c0_i32 = arith.constant 0 : i32
    %c0_i32_0 = arith.constant 0 : i32
    %c0_i32_1 = arith.constant 0 : i32
    return %c0_i32, %c0_i32_0 : i32, i32
  }
  func.func @transform_6(%arg0: i32, %arg1: i32) -> (i32, i32, i32) {
    %c0_i32 = arith.constant 0 : i32
    %c0_i32_0 = arith.constant 0 : i32
    return %arg0, %c0_i32, %arg1 : i32, i32, i32
  }
  func.func @transform_7(%arg0: i32, %arg1: i32) -> (i32, i32, i32) {
    %c0_i32 = arith.constant 0 : i32
    %c0_i32_0 = arith.constant 0 : i32
    %c0_i32_1 = arith.constant 0 : i32
    return %arg0, %c0_i32, %c0_i32_0 : i32, i32, i32
  }
  func.func @transform_8(%arg0: i32, %arg1: i32) -> (i32, i32, i32) {
    %c0_i32 = arith.constant 0 : i32
    %c0_i32_0 = arith.constant 0 : i32
    %c0_i32_1 = arith.constant 0 : i32
    return %arg0, %c0_i32, %c0_i32_0 : i32, i32, i32
  }
}

</mosaic_0001>

<bundles_post_ra>
// kernel: attention_block.5
= control target key start
LH: loop header
LB: loop body
LE: loop exit
PB: predicated region body
PF: predicated region fallthrough
CT: control target
= control target key end

     0   :  { %8 = vsyncpa [#allocation3], 0  ;;  %s156_s0 = inlined_call_operand.vmem [shape: f32[2,4,256], index: 0, kind: input, shape index: {}]   ;;  %s157_s1 = inlined_call_operand.vmem [shape: f32[2,1,256], index: 1, kind: input, shape index: {}]   ;;  %s158_s2 = inlined_call_operand.vmem [shape: f32[2], index: 2, kind: input, shape index: {}]   ;;  %s159_s3 = inlined_call_operand.vmem [shape: f32[2,4,256], index: 3, kind: output, shape index: {}]  }
   0x1   :  { %s19_s14 = sshll.u32 %s158_s2, 4  ;;  %s20_s14 = int_to_ptr.vmem [resolvable:$true] %s19_s14 }
   0x2   :  { %s100_s15 = scalar_lea.vmem %s20_s14, 16  ;;  %p105_p1 = scmp.lt.s32.totalorder %s20_s14, %s20_s14 }
   0x3   :  { %p101_p0 = scmp.ne.s32.totalorder %s20_s14, %s100_s15  ;;  %p106_p2 = scmp.lt.s32.totalorder %s100_s15, %s100_s15 }
   0x5   :  { %p107_p3 = por %p106_p2, %p105_p1 }
   0x7   :  { %p108_p4 = pnand %p107_p3, %p101_p0 }
   0x9   :  { %111 = shalt.err (!%p108_p4)
}
   0xa   :  { %s114_s16 = smov [#allocation2]  }
   0xb   :  { %22 = dma.vmem_to_smem %s20_s14, 16, %s114_s16, [#allocation3]  }
   0xc   :  { %112 = dma.done.wait [#allocation3], 16  }
   0xd   :  { %113 = vsyncadd [#allocation3], 4294967280 }
   0xe   :  { %26 = sfence }
   0xf   :  { %s27_s17 = sld [smem:[#allocation2]]  ;;  %s85_s18 = sld [smem:[#allocation2 + $0x1]]  ;;  %v29_v0 = vld [vmem:[%s157_s1] sm:$0x3]  ;;  %v87_v1 = vld [vmem:[%s157_s1 + $0x2] sm:$0x3]  ;;  %v42_v13 = vlaneseq }
  0x10   :  { %v40_v22 = vld [vmem:[%s156_s0] sm:$0xff]  ;;  %v89_v26 = vld [vmem:[%s156_s0 + $0x8] sm:$0xff] }
  0x11   :  { %v43_v15 = vshrl.u32 %v42_v13, 7 }
  0x13   :  { %v44_v16 = vsub.s32 0, %v43_v15  ;;  %v48_v17 = vsub.s32 1, %v43_v15 }
  0x15   :  { %v30_v2 = vstv %s27_s17  ;;  %v32_v3 = vstv %s85_s18 }
  0x16   :  { %v31_v4 = vmul.f32 %v30_v2, %v29_v0  ;;  %v56_v5 = vmul.f32 %v87_v1, %v30_v2 }
  0x18   :  { %v33_v6 = vadd.f32 %v32_v3, %v31_v4  ;;  %v57_v7 = vadd.f32 %v56_v5, %v32_v3 }
  0x1a   :  { %v86_v8 = vmul.f32 -1.442695, %v33_v6  ;;  %v88_v9 = vmul.f32 -1.442695, %v57_v7 }
  0x1c   :  { %92 = vpow2.f32 %v86_v8 }
  0x1d   :  { %94 = vpow2.f32 %v88_v9 }
  0x26   :  { %v93_v10 = vpop.eup %92 }
  0x27   :  { %v95_v11 = vpop.eup %94  ;;  %v37_v12 = vadd.f32 1.0, %v93_v10 }
  0x28   :  { %v61_v14 = vadd.f32 1.0, %v95_v11 }
  0x29   :  { %96 = vrcp.f32 %v37_v12 }
  0x2a   :  { %98 = vrcp.f32 %v61_v14 }
  0x33   :  { %v97_v18 = vpop.eup %96 }
  0x34   :  { %v99_v19 = vpop.eup %98  ;;  %v45_v20 = vrot.slane %v97_v18, %v44_v16  ;;  %v49_v21 = vrot.slane %v97_v18, %v48_v17 }
  0x35   :  { %v70_v23 = vrot.slane %v99_v19, %v44_v16  ;;  %v74_v24 = vrot.slane %v99_v19, %v48_v17 }
  0x36   :  { %v50_v25 = vcombine.low %v45_v20, %v49_v21 }
  0x37   :  { %v75_v27 = vcombine.low %v70_v23, %v74_v24 }
  0x38   :  { %v52_v28 = vmul.f32 %v50_v25, %v40_v22 }
  0x39   :  { %v77_v29 = vmul.f32 %v89_v26, %v75_v27 }
  0x3a   :  { %53 = vst [vmem:[%s159_s3] sm:$0xff] %v52_v28 }
  0x3b   :  { %90 = vst [vmem:[%s159_s3 + $0x8] sm:$0xff] %v77_v29 }
  0x3c   :  { %84 = vsyncpa [#allocation3], 1 }

// kernel: attention_block.3
= control target key start
LH: loop header
LB: loop body
LE: loop exit
PB: predicated region body
PF: predicated region fallthrough
CT: control target
= control target key end

     0   :  { %vm43_vm0 = vcmask 1041408   ;;  %v344_v3 = vmov 0   ;;  %vm39_vm1 = vcmask 31744   ;;  %vm26_vm2 = vcmask 7168   ;;  %s484_s0 = inlined_call_operand.vmem [shape: f32[2,4,256], index: 0, kind: input, shape index: {}]   ;;  %s485_s1 = inlined_call_operand.vmem [shape: f32[2,4,256], index: 1, kind: input, shape index: {}]   ;;  %s486_s2 = inlined_call_operand.vmem [shape: bf16[8,4], index: 2, kind: input, shape index: {}]   ;;  %s487_s3 = inlined_call_operand.vmem [shape: bf16[8,4], index: 3, kind: input, shape index: {}]   ;;  %s488_s6 = inlined_call_operand.vmem [shape: f32[1,8,1], index: 6, kind: output, shape index: {2}]   ;;  %s489_s4 = inlined_call_operand.vmem [shape: f32[1,8,1], index: 4, kind: output, shape index: {0}]   ;;  %s490_s7 = inlined_call_operand.vmem [shape: f32[1,8,1], index: 7, kind: output, shape index: {3}]   ;;  %s491_s5 = inlined_call_operand.vmem [shape: f32[1,8,1], index: 5, kind: output, shape index: {1}]  }
   0x1   :  { %v33_v0 = vld [vmem:[%s484_s0] sm:$0xff]  ;;  %v332_v1 = vld [vmem:[%s484_s0 + $0x8] sm:$0xff]  ;;  %82 = vmatprep.mubr.bf16.mxu0 %v344_v3  ;;  %138 = vmatprep.mubr.bf16.mxu1 %v344_v3  ;;  %v345_v23 = vmov 0.0  }
   0x2   :  { %v91_v2 = vld [vmem:[%s485_s1] sm:$0xff]  ;;  %v35_v4 = vcombine.high %v33_v0, %v33_v0  ;;  %v179_v5 = vcombine.high %v332_v1, %v332_v1  ;;  %v335_v7 = vld [vmem:[%s485_s1 + $0x8] sm:$0xff]  ;;  %v37_v8 = vpack.c.bf16 %v33_v0, %v33_v0  ;;  %v181_v11 = vpack.c.bf16 %v332_v1, %v332_v1  ;;  %29 = vst.msk [vmem:[%s488_s6] sm:$0xff] %vm26_vm2, %v345_v23 }
   0x3   :  { %v93_v6 = vcombine.high %v91_v2, %v91_v2  ;;  %v233_v9 = vcombine.high %v335_v7, %v335_v7  ;;  %v95_v10 = vpack.c.bf16 %v91_v2, %v91_v2  ;;  %v235_v12 = vpack.c.bf16 %v335_v7, %v335_v7  ;;  %v31_v19 = vld [vmem:[%s486_s2] sm:$0xf]  ;;  %27 = vst.msk [vmem:[%s489_s4] sm:$0xff] %vm26_vm2, %v345_v23 }
   0x4   :  { %v38_v13 = vpack.c.bf16 %v35_v4, %v35_v4  ;;  %v182_v14 = vpack.c.bf16 %v179_v5, %v179_v5  ;;  %v45_v16 = vsel %vm43_vm0, %v37_v8, 0  ;;  %v32_v20 = vld [vmem:[%s487_s3] sm:$0xf]  ;;  %v184_v21 = vsel %vm43_vm0, %v181_v11, 0  ;;  %30 = vst.msk [vmem:[%s490_s7] sm:$0xff] %vm26_vm2, %v345_v23  ;;  %28 = vst.msk [vmem:[%s491_s5] sm:$0xff] %vm26_vm2, %v345_v23 }
   0x5   :  { %v96_v15 = vpack.c.bf16 %v93_v6, %v93_v6  ;;  %v236_v17 = vpack.c.bf16 %v233_v9, %v233_v9  ;;  %v101_v18 = vsel %vm43_vm0, %v95_v10, 0  ;;  %v238_v22 = vsel %vm43_vm0, %v235_v12, 0 }
   0x6   :  { %328 = vmatprep.subr.msk.bf16.mxu0 %vm43_vm0, %v38_v13 }
   0x7   :  { %330 = vmatprep.subr.msk.bf16.mxu1 %vm43_vm0, %v96_v15  ;;  %51 = vmatpush1.bf16.msra.mxu0 %v45_v16 }
   0x8   :  { %107 = vmatpush1.bf16.msra.mxu1 %v101_v18  ;;  %333 = vmatprep.subr.msk.bf16.mxu0 %vm43_vm0, %v182_v14 }
   0x9   :  { %336 = vmatprep.subr.msk.bf16.mxu1 %vm43_vm0, %v236_v17  ;;  %v162_v56 = vld [vmem:[%s488_s6] sm:$0xff] }
   0xa   :  { %329 = vmatmul.mubr.msk.bf16.vlgmr.msra.gmra.mrb[0].mxu0 %vm39_vm1, %v31_v19  ;;  %v147_v57 = vld [vmem:[%s489_s4] sm:$0xff] }
   0xb   :  { %331 = vmatmul.mubr.msk.bf16.vlgmr.msra.gmra.mrb[0].mxu1 %vm39_vm1, %v32_v20  ;;  %190 = vmatpush1.bf16.msra.mxu0 %v184_v21  ;;  %v168_v62 = vld [vmem:[%s490_s7] sm:$0xff] }
   0xc   :  { %244 = vmatpush1.bf16.msra.mxu1 %v238_v22  ;;  %221 = vmatprep.mubr.bf16.mxu0 %v344_v3  ;;  %v154_v63 = vld [vmem:[%s491_s5] sm:$0xff] }
   0xd   :  { %275 = vmatprep.mubr.bf16.mxu1 %v344_v3 }
  0x12   :  { %334 = vmatmul.mubr.msk.bf16.vlgmr.msra.gmra.mrb[4].mxu0 %vm39_vm1, %v31_v19 }
  0x13   :  { %337 = vmatmul.mubr.msk.bf16.vlgmr.msra.gmra.mrb[4].mxu1 %vm39_vm1, %v32_v20 }
  0xdd   :  { %v84_v24 = vpop.f32.mrb[0].mxu0 }
  0xde   :  { %v140_v25 = vpop.f32.mrb[0].mxu1  ;;  %v155_v26 = vmul.f32 %v84_v24, %v84_v24  ;;  %v86_v28 = vpop.f32.mrb[1].mxu0 }
  0xdf   :  { %v169_v27 = vmul.f32 %v140_v25, %v140_v25  ;;  %v142_v29 = vpop.f32.mrb[1].mxu1  ;;  %v156_v30 = vmul.f32 %v86_v28, %v86_v28  ;;  %v88_v32 = vpop.f32.mrb[2].mxu0  ;;  %v148_v35 = vadd.f32 %v86_v28, %v84_v24 }
  0xe0   :  { %v170_v31 = vmul.f32 %v142_v29, %v142_v29  ;;  %v144_v33 = vpop.f32.mrb[2].mxu1  ;;  %v163_v34 = vadd.f32 %v142_v29, %v140_v25  ;;  %v89_v36 = vpop.f32.mrb[3].mxu0 }
  0xe1   :  { %v145_v37 = vpop.f32.mrb[3].mxu1  ;;  %149 = vadd.xlane.f32.xlu0 %v148_v35  ;;  %v157_v39 = vadd.f32 %v156_v30, %v155_v26 }
  0xe2   :  { %164 = vadd.xlane.f32.xlu1 %v163_v34  ;;  %v171_v38 = vadd.f32 %v170_v31, %v169_v27 }
  0xe5   :  { %158 = vadd.xlane.f32.xlu0 %v157_v39  ;;  %v223_v40 = vpop.f32.mrb[4].mxu0 }
  0xe6   :  { %172 = vadd.xlane.f32.xlu1 %v171_v38  ;;  %v277_v41 = vpop.f32.mrb[4].mxu1  ;;  %v291_v42 = vmul.f32 %v223_v40, %v223_v40  ;;  %v225_v43 = vpop.f32.mrb[5].mxu0 }
  0xe7   :  { %v305_v44 = vmul.f32 %v277_v41, %v277_v41  ;;  %v279_v45 = vpop.f32.mrb[5].mxu1  ;;  %v292_v46 = vmul.f32 %v225_v43, %v225_v43  ;;  %v227_v47 = vpop.f32.mrb[6].mxu0  ;;  %v285_v50 = vadd.f32 %v225_v43, %v223_v40 }
  0xe8   :  { %v306_v48 = vmul.f32 %v279_v45, %v279_v45  ;;  %v281_v49 = vpop.f32.mrb[6].mxu1  ;;  %v299_v51 = vadd.f32 %v279_v45, %v277_v41  ;;  %v228_v52 = vpop.f32.mrb[7].mxu0 }
  0xe9   :  { %v282_v53 = vpop.f32.mrb[7].mxu1  ;;  %286 = vadd.xlane.f32.xlu0 %v285_v50  ;;  %v293_v54 = vadd.f32 %v292_v46, %v291_v42 }
  0xea   :  { %v307_v55 = vadd.f32 %v306_v48, %v305_v44 }
  0xeb   :  { %294 = vadd.xlane.f32.xlu1 %v293_v54 }
  0xed   :  { %300 = vadd.xlane.f32.xlu0 %v299_v51 }
  0xef   :  { %308 = vadd.xlane.f32.xlu1 %v307_v55 }
 0x16e   :  { %v150_v59 = vpop.xlane.xlu0 %149 }
 0x16f   :  { %v165_v58 = vpop.xlane.xlu1 %164  ;;  %v151_v61 = vadd.f32 %v150_v59, %v147_v57 }
 0x170   :  { %v166_v60 = vadd.f32 %v165_v58, %v162_v56 }
 0x171   :  { %153 = vst.msk [vmem:[%s489_s4] sm:$0xff] %vm26_vm2, %v151_v61 }
 0x172   :  { %167 = vst.msk [vmem:[%s488_s6] sm:$0xff] %vm26_vm2, %v166_v60  ;;  %v159_v1 = vpop.xlane.xlu0 %158 }
 0x173   :  { %v173_v0 = vpop.xlane.xlu1 %172  ;;  %v160_v3 = vadd.f32 %v159_v1, %v154_v63 }
 0x174   :  { %v174_v2 = vadd.f32 %v173_v0, %v168_v62 }
 0x175   :  { %161 = vst.msk [vmem:[%s491_s5] sm:$0xff] %vm26_vm2, %v160_v3 }
 0x176   :  { %175 = vst.msk [vmem:[%s490_s7] sm:$0xff] %vm26_vm2, %v174_v2  ;;  %v287_v4 = vpop.xlane.xlu0 %286 }
 0x178   :  { %v284_v5 = vld [vmem:[%s489_s4] sm:$0xff]  ;;  %v295_v6 = vpop.xlane.xlu1 %294 }
 0x179   :  { %v288_v7 = vadd.f32 %v287_v4, %v284_v5  ;;  %v298_v8 = vld [vmem:[%s488_s6] sm:$0xff] }
 0x17a   :  { %v301_v9 = vpop.xlane.xlu0 %300 }
 0x17b   :  { %289 = vst.msk [vmem:[%s489_s4] sm:$0xff] %vm26_vm2, %v288_v7  ;;  %v302_v10 = vadd.f32 %v301_v9, %v298_v8 }
 0x17c   :  { %v290_v11 = vld [vmem:[%s491_s5] sm:$0xff]  ;;  %v309_v13 = vpop.xlane.xlu1 %308 }
 0x17d   :  { %v304_v12 = vld [vmem:[%s490_s7] sm:$0xff]  ;;  %v296_v14 = vadd.f32 %v295_v6, %v290_v11  ;;  %303 = vst.msk [vmem:[%s488_s6] sm:$0xff] %vm26_vm2, %v302_v10 }
 0x17e   :  { %v310_v15 = vadd.f32 %v309_v13, %v304_v12 }
 0x17f   :  { %297 = vst.msk [vmem:[%s491_s5] sm:$0xff] %vm26_vm2, %v296_v14 }
 0x180   :  { %311 = vst.msk [vmem:[%s490_s7] sm:$0xff] %vm26_vm2, %v310_v15 }

// kernel: attention_block.4
= control target key start
LH: loop header
LB: loop body
LE: loop exit
PB: predicated region body
PF: predicated region fallthrough
CT: control target
= control target key end

     0   :  { %14 = vsyncpa [#allocation3], 0  ;;  %vm56_vm0 = vcmask 1041408   ;;  %v605_v6 = vmov 0   ;;  %s751_s0 = inlined_call_operand.vmem [shape: f32[2,4,256], index: 0, kind: input, shape index: {}]   ;;  %s752_s1 = inlined_call_operand.vmem [shape: f32[2,4,256], index: 1, kind: input, shape index: {}]   ;;  %s753_s2 = inlined_call_operand.vmem [shape: bf16[8,4], index: 2, kind: input, shape index: {}]   ;;  %s754_s3 = inlined_call_operand.vmem [shape: bf16[8,4], index: 3, kind: input, shape index: {}]   ;;  %s755_s4 = inlined_call_operand.vmem [shape: f32[8,1], index: 4, kind: input, shape index: {}]   ;;  %s756_s5 = inlined_call_operand.vmem [shape: f32[1,8], index: 5, kind: input, shape index: {}]   ;;  %s757_s6 = inlined_call_operand.vmem [shape: f32[2,1,256], index: 6, kind: output, shape index: {0}]   ;;  %s758_s7 = inlined_call_operand.hbm [shape: f32[1,1,1], index: 7, kind: output, shape index: {1}]   ;;  %s759_s8 = inlined_call_operand.hbm [shape: f32[1,1,1], index: 8, kind: output, shape index: {2}]  }
   0x1   :  { %v46_v0 = vld [vmem:[%s752_s1] sm:$0xff]  ;;  %95 = vmatprep.mubr.bf16.mxu0 %v605_v6 }
   0x2   :  { %v40_v1 = vld [vmem:[%s751_s0] sm:$0xff]  ;;  %v48_v2 = vcombine.high %v46_v0, %v46_v0  ;;  %v50_v4 = vpack.c.bf16 %v46_v0, %v46_v0 }
   0x3   :  { %v42_v3 = vcombine.high %v40_v1, %v40_v1  ;;  %v44_v5 = vpack.c.bf16 %v40_v1, %v40_v1  ;;  %v38_v7 = vld [vmem:[%s755_s4] sm:$0xff] }
   0x4   :  { %15 = vsyncpa [#allocation5], 0  ;;  %145 = vmatprep.mubr.bf16.mxu1 %v605_v6  ;;  %552 = vset.pattern.permute.xlu0 %v605_v6  ;;  %v51_v8 = vpack.c.bf16 %v48_v2, %v48_v2  ;;  %v58_v10 = vsel %vm56_vm0, %v50_v4, 0  ;;  %v37_v12 = vld [vmem:[%s754_s3] sm:$0xf]  ;;  %vm52_vm1 = vcmask 31744   ;;  %v244_v47 = vlaneseq }
   0x5   :  { %v45_v9 = vpack.c.bf16 %v42_v3, %v42_v3  ;;  %v108_v11 = vsel %vm56_vm0, %v44_v5, 0  ;;  %156 = vperm.xlu0 %552, %v38_v7   ;;  %v36_v13 = vld [vmem:[%s753_s2] sm:$0xf]  ;;  %v540_v14 = vld [vmem:[%s752_s1 + $0x8] sm:$0xff]  ;;  %vm33_vm2 = vcmask 0   ;;  %v606_v19 = vmov 0.0  }
   0x6   :  { %534 = vmatprep.subr.msk.bf16.mxu0 %vm56_vm0, %v51_v8  ;;  %v291_v15 = vcombine.high %v540_v14, %v540_v14  ;;  %v293_v17 = vpack.c.bf16 %v540_v14, %v540_v14  ;;  %34 = vst.msk [vmem:[#allocation2] sm:$0x1] %vm33_vm2, %v606_v19  ;;  %35 = vst.msk [vmem:[#allocation4] sm:$0x1] %vm33_vm2, %v606_v19  ;;  %v539_v21 = vld [vmem:[%s751_s0 + $0x8] sm:$0xff]  ;;  %vm163_vm3 = vcmask 64512  }
   0x7   :  { %536 = vmatprep.subr.msk.bf16.mxu1 %vm56_vm0, %v45_v9  ;;  %64 = vmatpush1.bf16.msra.mxu0 %v58_v10  ;;  %v284_v30 = vcombine.high %v539_v21, %v539_v21  ;;  %v286_v35 = vpack.c.bf16 %v539_v21, %v539_v21  ;;  %v39_v39 = vld [vmem:[%s756_s5] sm:$0x1]  ;;  %v607_v45 = vmov 1966171168   ;;  %v245_v49 = vshrl.u32 %v244_v47, 7  ;;  %s608_s19 = smov [#allocation2]  }
   0x8   :  { %114 = vmatpush1.bf16.msra.mxu1 %v108_v11  ;;  %v294_v16 = vpack.c.bf16 %v291_v15, %v291_v15  ;;  %v296_v18 = vsel %vm56_vm0, %v293_v17, 0  ;;  %v242_v46 = vunpack.c.l.s4 %v607_v45  ;;  %vm262_vm4 = vcmask 1040384   ;;  %s510_s20 = sshll.u32 %s608_s19, 4  ;;  %s609_s21 = smov [#allocation4]   ;;  %s511_s20 = int_to_ptr.vmem [resolvable:$true] %s510_s20 }
   0x9   :  { %v287_v37 = vpack.c.bf16 %v284_v30, %v284_v30  ;;  %v343_v40 = vsel %vm56_vm0, %v286_v35, 0  ;;  %vm702_vm5 = vcmp.lt.s32.totalorder %v244_v47, 256  ;;  %s520_s22 = sshll.u32 %s609_s21, 4  ;;  %s557_s23 = scalar_lea.vmem %s511_s20, 16  ;;  %s521_s22 = int_to_ptr.vmem [resolvable:$true] %s520_s22 }
   0xa   :  { %535 = vmatmul.mubr.msk.bf16.vlgmr.msra.gmra.mrb[0].mxu0 %vm52_vm1, %v37_v12  ;;  %541 = vmatprep.subr.msk.bf16.mxu1 %vm56_vm0, %v294_v16  ;;  %v243_v48 = vunpack.c.0.s8 %v242_v46  ;;  %p558_p0 = scmp.ne.s32.totalorder %s511_s20, %s557_s23  ;;  %s561_s24 = scalar_lea.vmem %s511_s20, 32 }
   0xb   :  { %537 = vmatmul.mubr.msk.bf16.vlgmr.msra.gmra.mrb[0].mxu1 %vm52_vm1, %v36_v13  ;;  %231 = vmatprep.mubr.f32.mxu0 %v606_v19  ;;  %p562_p1 = scmp.lt.s32.totalorder %s511_s20, %s511_s20  ;;  %p563_p2 = scmp.lt.s32.totalorder %s561_s24, %s557_s23 }
   0xc   :  { %333 = vmatprep.mubr.bf16.mxu1 %v605_v6  ;;  %302 = vmatpush1.bf16.msra.mxu1 %v296_v18  ;;  %v246_v51 = vsub.s32 %v243_v48, %v245_v49 }
   0xd   :  { %v261_v11 = vld [vmem:[#allocation2] sm:$0x1]  ;;  %p564_p3 = por %p563_p2, %p562_p1 }
   0xf   :  { %p565_p4 = pnand %p564_p3, %p558_p0 }
  0x13   :  { %542 = vmatmul.mubr.msk.bf16.vlgmr.msra.gmra.mrb[4].mxu1 %vm52_vm1, %v37_v12 }
  0x14   :  { %457 = vmatprep.mubr.f32.mxu1 %v606_v19 }
  0x84   :  { %v684_v20 = vpop.permute.xlu0 %156 }
  0xdd   :  { %v97_v22 = vpop.f32.mrb[0].mxu0 }
  0xde   :  { %v147_v23 = vpop.f32.mrb[0].mxu1  ;;  %v99_v25 = vpop.f32.mrb[1].mxu0 }
  0xdf   :  { %v148_v24 = vadd.f32 %v147_v23, %v97_v22  ;;  %v149_v26 = vpop.f32.mrb[1].mxu1  ;;  %v101_v28 = vpop.f32.mrb[2].mxu0 }
  0xe0   :  { %v150_v27 = vadd.f32 %v149_v26, %v99_v25  ;;  %v151_v29 = vpop.f32.mrb[2].mxu1  ;;  %v102_v32 = vpop.f32.mrb[3].mxu0 }
  0xe1   :  { %v159_v31 = vadd.f32 %v684_v20, %v148_v24  ;;  %v152_v33 = vpop.f32.mrb[3].mxu1 }
  0xe2   :  { %v160_v34 = vadd.f32 %v684_v20, %v150_v27 }
  0xe3   :  { %v161_v38 = vmax.f32 %v159_v31, 0.0 }
  0xe4   :  { %v162_v36 = vmax.f32 %v160_v34, 0.0 }
  0xe6   :  { %167 = vmatprep.subr.mxu0 %v162_v36  ;;  %v335_v41 = vpop.f32.mrb[4].mxu1 }
  0xe7   :  { %168 = vmatpush1.msra.mxu0 %v161_v38  ;;  %v337_v42 = vpop.f32.mrb[5].mxu1 }
  0xe8   :  { %538 = vmatmul.mubr.msk.f32.vlgmr.msra.gmra.mrb[4].mxu0 %vm163_vm3, %v39_v39  ;;  %543 = vmatprep.subr.msk.bf16.mxu0 %vm56_vm0, %v287_v37  ;;  %v339_v43 = vpop.f32.mrb[6].mxu1 }
  0xe9   :  { %349 = vmatpush1.bf16.msra.mxu0 %v343_v40  ;;  %380 = vmatprep.mubr.bf16.mxu0 %v605_v6  ;;  %v340_v44 = vpop.f32.mrb[7].mxu1 }
  0xec   :  { %544 = vmatmul.mubr.msk.bf16.vlgmr.msra.gmra.mrb[8].mxu0 %vm52_vm1, %v36_v13  ;;  %v271_v13 = vld [vmem:[#allocation4] sm:$0x1] }
 0x1bb   :  { %v233_v50 = vpop.f32.mrb[4].mxu0 }
 0x1bc   :  { %v235_v52 = vpop.f32.mrb[5].mxu0  ;;  %v263_v53 = vsel %vm262_vm4, %v233_v50, 0.0  ;;  %v272_v54 = vmul.f32 %v233_v50, %v233_v50 }
 0x1bd   :  { %v240_v55 = vcombine.low %v233_v50, %v235_v52  ;;  %v264_v56 = vsel %vm262_vm4, %v235_v52, 0.0  ;;  %v273_v57 = vmul.f32 %v235_v52, %v235_v52 }
 0x1be   :  { %v265_v58 = vadd.f32 %v264_v56, %v263_v53  ;;  %v274_v59 = vsel %vm262_vm4, %v272_v54, 0.0 }
 0x1bf   :  { %v247_v60 = vrot.slane %v240_v55, %v246_v51  ;;  %v382_v61 = vpop.f32.mrb[8].mxu0  ;;  %v275_v62 = vsel %vm262_vm4, %v273_v57, 0.0 }
 0x1c0   :  { %v383_v63 = vadd.f32 %v382_v61, %v335_v41  ;;  %v384_v0 = vpop.f32.mrb[9].mxu0  ;;  %266 = vadd.xlane.f32.xlu0 %v265_v58  ;;  %v276_v1 = vadd.f32 %v275_v62, %v274_v59 }
 0x1c1   :  { %v254_v3 = vrot.slane %v247_v60, %v246_v51  ;;  %v385_v4 = vadd.f32 %v384_v0, %v337_v42  ;;  %v386_v5 = vpop.f32.mrb[10].mxu0 }
 0x1c2   :  { %v389_v6 = vadd.f32 %v383_v63, %v684_v20  ;;  %v387_v7 = vpop.f32.mrb[11].mxu0  ;;  %277 = vadd.xlane.f32.xlu1 %v276_v1 }
 0x1c3   :  { %v390_v8 = vadd.f32 %v385_v4, %v684_v20  ;;  %260 = vst.msk [vmem:[%s757_s6] sm:$0x3] %vm702_vm5, %v254_v3 }
 0x1c4   :  { %v391_v10 = vmax.f32 %v389_v6, 0.0 }
 0x1c5   :  { %v392_v9 = vmax.f32 %v390_v8, 0.0 }
 0x1c7   :  { %393 = vmatprep.subr.mxu1 %v392_v9 }
 0x1c8   :  { %394 = vmatpush1.msra.mxu1 %v391_v10 }
 0x1c9   :  { %545 = vmatmul.mubr.msk.f32.vlgmr.msra.gmra.mrb[8].mxu1 %vm163_vm3, %v39_v39 }
 0x24d   :  { %v267_v12 = vpop.xlane.xlu0 %266 }
 0x24e   :  { %v268_v14 = vadd.f32 %v267_v12, %v261_v11 }
 0x24f   :  { %v278_v15 = vpop.xlane.xlu1 %277 }
 0x250   :  { %270 = vst.msk [vmem:[#allocation2] sm:$0x1] %vm33_vm2, %v268_v14  ;;  %v279_v16 = vadd.f32 %v278_v15, %v271_v13 }
 0x252   :  { %280 = vst.msk [vmem:[#allocation4] sm:$0x1] %vm33_vm2, %v279_v16 }
 0x257   :  { %v484_v31 = vld [vmem:[#allocation2] sm:$0x1] }
 0x259   :  { %v492_v34 = vld [vmem:[#allocation4] sm:$0x1] }
 0x29c   :  { %v459_v17 = vpop.f32.mrb[8].mxu1 }
 0x29d   :  { %v493_v18 = vmul.f32 %v459_v17, %v459_v17  ;;  %v461_v19 = vpop.f32.mrb[9].mxu1  ;;  %v485_v20 = vsel %vm262_vm4, %v459_v17, 0.0 }
 0x29e   :  { %v466_v21 = vcombine.low %v459_v17, %v461_v19  ;;  %v486_v22 = vsel %vm262_vm4, %v461_v19, 0.0  ;;  %v494_v23 = vmul.f32 %v461_v19, %v461_v19 }
 0x29f   :  { %v487_v24 = vadd.f32 %v486_v22, %v485_v20  ;;  %v495_v25 = vsel %vm262_vm4, %v493_v18, 0.0 }
 0x2a0   :  { %v473_v26 = vrot.slane %v466_v21, %v246_v51  ;;  %v496_v27 = vsel %vm262_vm4, %v494_v23, 0.0 }
 0x2a1   :  { %488 = vadd.xlane.f32.xlu1 %v487_v24  ;;  %v497_v28 = vadd.f32 %v496_v27, %v495_v25 }
 0x2a2   :  { %v480_v29 = vrot.slane %v473_v26, %v246_v51 }
 0x2a4   :  { %546 = vst.msk [vmem:[%s757_s6 + $0x2] sm:$0x3] %vm702_vm5, %v480_v29 }
 0x2a5   :  { %498 = vadd.xlane.f32.xlu1 %v497_v28 }
 0x32e   :  { %v489_v30 = vpop.xlane.xlu1 %488 }
 0x32f   :  { %v490_v32 = vadd.f32 %v489_v30, %v484_v31 }
 0x331   :  { %491 = vst.msk [vmem:[#allocation2] sm:$0x1] %vm33_vm2, %v490_v32 }
 0x332   :  { %v499_v33 = vpop.xlane.xlu1 %498 }
 0x333   :  { %568 = shalt.err (!%p565_p4)
}
 0x334   :  { %s569_s26 = scalar_lea.hbm %s758_s7, 16 }
 0x335   :  { %p570_p5 = scmp.ne.s32.totalorder %s758_s7, %s569_s26  ;;  %p573_p6 = scmp.lt.u32.totalorder %s569_s26, %s758_s7 }
 0x337   :  { %p575_p7 = pnand %p573_p6, %p570_p5 }
 0x339   :  { %578 = shalt.err (!%p575_p7)
}
 0x33a   :  { %513 = dma.vmem_to_hbm [thread:$0]  %s511_s20, 16, %s758_s7, [#allocation3]   ;;  %v500_v35 = vadd.f32 %v499_v33, %v492_v34 }
 0x33b   :  { %s579_s11 = scalar_lea.vmem %s521_s22, 16  ;;  %s583_s12 = scalar_lea.vmem %s521_s22, 32 }
 0x33c   :  { %501 = vst.msk [vmem:[#allocation4] sm:$0x1] %vm33_vm2, %v500_v35  ;;  %p580_p8 = scmp.ne.s32.totalorder %s521_s22, %s579_s11  ;;  %p584_p9 = scmp.lt.s32.totalorder %s521_s22, %s521_s22 }
 0x33d   :  { %p585_p10 = scmp.lt.s32.totalorder %s583_s12, %s579_s11 }
 0x33f   :  { %p586_p11 = por %p585_p10, %p584_p9 }
 0x341   :  { %p587_p12 = pnand %p586_p11, %p580_p8 }
 0x343   :  { %590 = shalt.err (!%p587_p12)
}
 0x344   :  { %s591_s14 = scalar_lea.hbm %s759_s8, 16 }
 0x345   :  { %p592_p13 = scmp.ne.s32.totalorder %s759_s8, %s591_s14  ;;  %p595_p0 = scmp.lt.u32.totalorder %s591_s14, %s759_s8 }
 0x347   :  { %p597_p1 = pnand %p595_p0, %p592_p13 }
 0x349   :  { %600 = shalt.err (!%p597_p1)
}
 0x34a   :  { %523 = dma.vmem_to_hbm [thread:$0]  %s521_s22, 16, %s759_s8, [#allocation5]  }
 0x34b   :  { %601 = dma.done.wait [#allocation3], 16  }
 0x34c   :  { %602 = vsyncadd [#allocation3], 4294967280 }
 0x34d   :  { %603 = dma.done.wait [#allocation5], 16  }
 0x34e   :  { %604 = vsyncadd [#allocation5], 4294967280 }
 0x34f   :  { %532 = vsyncpa [#allocation3], 1 }
 0x350   :  { %533 = vsyncpa [#allocation5], 1 }

</bundles_post_ra>
